<compile_context>
chip_gen: v7x
topology: tpu7x:2x2x1
jax: 0.10.0
libtpu: 0.0.40
codegen_flags: <defaults>
</compile_context>

<pallas_src>
import math
from functools import partial

import jax
import jax.numpy as jnp
from jax.experimental import pallas as pl
from jax.experimental.pallas import tpu as pltpu


def _round_up(x, m):
    return (x + m - 1) // m * m


def _pad_to(x, shape):
    return jnp.pad(x, [(0, s - d) for d, s in zip(x.shape, shape)])


# ----------------------------------------------------------------------------
# Pallas kernel: per-edge message MLP -> masked mean -> LN -> dense MLP -> LN
# ----------------------------------------------------------------------------
def ipmp_node_kernel(msg_ref, hv_ref, geo_ref, es_ref, mv_ref,
                     w1v_ref, w1g_ref, w1e_ref, b1_ref, w2_ref, b2_ref,
                     w3_ref, b3_ref, g0_ref, be0_ref,
                     wd1_ref, bd1_ref, wd2_ref, bd2_ref, g1_ref, be1_ref,
                     out_ref, *, h_real):
    K, TM, De = msg_ref.shape
    Hp = hv_ref.shape[-1]

    hv = hv_ref[...]                                            # f32 [TM, Hp]

    # ---- node-invariant slice of layer 1, applied ONCE per node ----
    node_pre = (
        jnp.dot(hv.astype(jnp.bfloat16), w1v_ref[...],
                preferred_element_type=jnp.float32)
        + jnp.dot(geo_ref[...].astype(jnp.bfloat16), w1g_ref[...],
                  preferred_element_type=jnp.float32)
        + b1_ref[...])                                          # [TM, Hp]

    # ---- per-edge part of the message MLP (bf16 MXU, f32 accumulation) ----
    # K-major layout: merging (K, TM) is a pure view since TM % 16 == 0.
    x = msg_ref[...].reshape(K * TM, De)                        # bf16 view
    he = jnp.dot(x, w1e_ref[...], preferred_element_type=jnp.float32)
    h1 = jnp.maximum(he.reshape(K, TM, Hp) + node_pre[None, :, :], 0.0)
    h1 = h1.reshape(K * TM, Hp).astype(jnp.bfloat16)
    h2 = jnp.maximum(
        jnp.dot(h1, w2_ref[...], preferred_element_type=jnp.float32)
        + b2_ref[...], 0.0)                                     # f32 [K*TM, Hp]

    # ---- masked mean over neighbors BEFORE W3 (linear after last ReLU):
    #   mean_k es_k*(h2_k@W3 + b3) == (sum_k es_k*h2_k)@W3 + b3*sum_k es_k
    es = es_ref[...]                                            # [K, TM, 1] = mask/K
    pooled = jnp.sum(h2.reshape(K, TM, Hp) * es, axis=0)        # [TM, Hp]
    es_sum = jnp.sum(es, axis=0)                                # [TM, 1]
    node_m = (jnp.dot(pooled.astype(jnp.bfloat16), w3_ref[...],
                      preferred_element_type=jnp.float32)
              + b3_ref[...] * es_sum)                           # [TM, Hp]

    # ---- LayerNorm over the real (unpadded) feature lanes only ----
    lane_mask = (jax.lax.broadcasted_iota(jnp.int32, (1, Hp), 1)
                 < h_real).astype(jnp.float32)
    inv_h = 1.0 / float(h_real)

    def ln(v, g, b, eps=1e-5):
        mu = jnp.sum(v, axis=-1, keepdims=True) * inv_h
        diff = (v - mu) * lane_mask
        var = jnp.sum(diff * diff, axis=-1, keepdims=True) * inv_h
        return diff * jax.lax.rsqrt(var + eps) * g + b

    # dropout is identity in eval mode
    hv1 = ln(hv + node_m, g0_ref[...], be0_ref[...])

    # ---- node_dense: MLP(H -> 4H -> H), relu ----
    d = jnp.maximum(
        jnp.dot(hv1.astype(jnp.bfloat16), wd1_ref[...],
                preferred_element_type=jnp.float32) + bd1_ref[...], 0.0)
    d = jnp.dot(d.astype(jnp.bfloat16), wd2_ref[...],
                preferred_element_type=jnp.float32) + bd2_ref[...]

    hv2 = ln(hv1 + d, g1_ref[...], be1_ref[...])

    # ---- mask_V ----
    out_ref[...] = hv2 * mv_ref[...]


def run_node_update(msg, hv, geo, es, mv, weights, *, h_real, TM):
    """msg:[K,Mp,De] bf16, hv:[Mp,Hp] f32, geo:[Mp,G] f32, es:[K,Mp,1] f32,
    mv:[Mp,1] f32."""
    K, Mp, De = msg.shape
    Hp = hv.shape[-1]
    G = geo.shape[-1]
    grid = (Mp // TM,)

    in_specs = [
        pl.BlockSpec((K, TM, De), lambda i: (0, i, 0)),     # De unpadded in HBM
        pl.BlockSpec((TM, Hp), lambda i: (i, 0)),
        pl.BlockSpec((TM, G), lambda i: (i, 0)),
        pl.BlockSpec((K, TM, 1), lambda i: (0, i, 0)),
        pl.BlockSpec((TM, 1), lambda i: (i, 0)),
    ] + [pl.BlockSpec(w.shape, lambda i: (0, 0)) for w in weights]
    # NOTE: weight blocks are grid-invariant (index_map constant), so Pallas
    # only DMAs them once; their double-buffer allocation is a few hundred KB.

    return pl.pallas_call(
        partial(ipmp_node_kernel, h_real=h_real),
        out_shape=jax.ShapeDtypeStruct((Mp, Hp), jnp.float32),
        grid=grid,
        in_specs=in_specs,
        out_specs=pl.BlockSpec((TM, Hp), lambda i: (i, 0)),
        compiler_params=pltpu.CompilerParams(
            dimension_semantics=("parallel",),
            # Fits TM=256 with K up to ~32; safe on v7x's 64 MiB per-TC VMEM,
            # raise toward 48 MiB on v5e/v6e if sweeping TM to 512.
            vmem_limit_bytes=32 * 1024 * 1024),
    )(msg, hv, geo, es, mv, *weights)


# ----------------------------------------------------------------------------
# JAX glue: rigid frames, local/global points, neighbor gathers (K-leading)
# ----------------------------------------------------------------------------
def frames_from_3_points(p_neg_x_axis, origin, p_xy_plane, eps=1e-8):
    """OpenFold-style Rigid.from_3_points (as used by PIPPack's get_bb_frames)."""
    e0 = origin - p_neg_x_axis
    e1 = p_xy_plane - origin
    e0 = e0 / jnp.sqrt(jnp.sum(e0 * e0, axis=-1, keepdims=True) + eps)
    dot = jnp.sum(e0 * e1, axis=-1, keepdims=True)
    e1 = e1 - e0 * dot
    e1 = e1 / jnp.sqrt(jnp.sum(e1 * e1, axis=-1, keepdims=True) + eps)
    e2 = jnp.cross(e0, e1)
    R = jnp.stack([e0, e1, e2], axis=-1)   # columns are e0, e1, e2 -> [..., 3, 3]
    t = origin
    return R, t


def build_kernel_inputs(h_V, h_E, E_idx, X, Wp, bp, n_points, position_scale):
    """Returns:
       msg:      [K, B*L, De] bf16  (per-edge features, K-major, unpadded De)
       node_geo: [B*L, 4P]   f32   (K-invariant geometric node features)
    Per-edge feature order matches the W1 row split in ipmp_forward:
       [h_E, gathered h_V, nb_p_local (3P), nb_p_local_norm (P), nb_p_global_norm (P)]
    """
    B, L, node_dim = h_V.shape
    K = E_idx.shape[-1]
    P = n_points
    M = B * L

    N_at, CA, C_at = X[..., 0, :], X[..., 1, :], X[..., 2, :]
    R, t = frames_from_3_points(N_at, CA, C_at)        # R [B,L,3,3], t [B,L,3]
    t = t / position_scale                              # scale_translation(1/scale)

    # local points from node features; global = R @ p + t
    p_local = (h_V @ Wp + bp).reshape(B, L, P, 3)
    p_global = jnp.einsum('blij,blpj->blpi', R, p_local) + t[:, :, None, :]

    # K-invariant per-node geometric features (applied once per node in-kernel)
    p_local_norm = jnp.sqrt(jnp.sum(p_local ** 2, axis=-1) + 1e-8)   # [B,L,P]
    node_geo = jnp.concatenate(
        [p_local.reshape(B, L, 3 * P), p_local_norm], axis=-1).reshape(M, 4 * P)

    # ---- neighbor gathers with K leading (produces the kernel's HBM layout
    #      directly; no separate transpose / f32 materialize / cast passes) ----
    E_k = jnp.moveaxis(E_idx, -1, 0)                    # [K, B, L]
    b_idx = jnp.arange(B)[None, :, None]                # [1, B, 1]
    nb_hV = h_V[b_idx, E_k]                             # [K, B, L, node_dim]
    nb_pg = p_global[b_idx, E_k]                        # [K, B, L, P, 3]
    hE_k = jnp.moveaxis(h_E, 2, 0)                      # [K, B, L, edge_dim]

    # invert_apply: R^T @ (p - t)
    nb_pl = jnp.einsum('blji,kblpj->kblpi', R, nb_pg - t[None, :, :, None, :])
    nb_pl_norm = jnp.sqrt(jnp.sum(nb_pl ** 2, axis=-1) + 1e-8)       # [K,B,L,P]
    nb_pg_norm = jnp.sqrt(
        jnp.sum((p_global[None] - nb_pg) ** 2, axis=-1) + 1e-8)      # [K,B,L,P]

    bf = jnp.bfloat16
    msg = jnp.concatenate([
        hE_k.astype(bf),
        nb_hV.astype(bf),
        nb_pl.reshape(K, B, L, 3 * P).astype(bf),
        nb_pl_norm.astype(bf),
        nb_pg_norm.astype(bf),
    ], axis=-1).reshape(K, M, -1)
    return msg, node_geo


# ----------------------------------------------------------------------------
# Module wrapper
# ----------------------------------------------------------------------------
def ipmp_forward(params, h_V, h_E, E_idx, X, mask_V, mask_attend,
                 n_points=8, position_scale=10.0, tm_target=256):
    B, L, node_dim = h_V.shape
    edge_dim = h_E.shape[-1]
    K = E_idx.shape[-1]
    H = params['W3'].shape[-1]            # hidden_dim (== node_dim for residual)
    P = n_points
    G = 4 * P

    msg, node_geo = build_kernel_inputs(h_V, h_E, E_idx, X, params['Wp'],
                                        params['bp'], P, position_scale)
    De = msg.shape[-1]                    # node_dim + edge_dim + 5*P (unpadded)

    M = B * L
    Hp = _round_up(H, 128)
    H4p = _round_up(4 * H, 128)
    # TM multiple of 16 => in-kernel merge of (K, TM) on bf16 msg is a pure view
    TM = min(tm_target, _round_up(M, 16))
    Mp = _round_up(M, TM)

    # ---- data (row-padded only; feature dims left at real size in HBM) ----
    msg = jnp.pad(msg, ((0, 0), (0, Mp - M), (0, 0)))                 # bf16
    hv = jnp.pad(h_V.reshape(M, node_dim).astype(jnp.float32),
                 ((0, Mp - M), (0, Hp - node_dim)))
    geo = jnp.pad(node_geo.astype(jnp.float32), ((0, Mp - M), (0, 0)))
    es = (jnp.moveaxis(mask_attend, -1, 0).reshape(K, M).astype(jnp.float32)
          / float(K))                                                  # mean -> sum
    es = jnp.pad(es, ((0, 0), (0, Mp - M)))[..., None]                 # [K,Mp,1]
    mv = jnp.pad(mask_V.reshape(M, 1).astype(jnp.float32), ((0, Mp - M), (0, 0)))

    # ---- weights: split W1 into node(h_V) / node(geo) / edge slices ----
    # W1 row order (matches message_in concat): [h_V | h_E | nb_hV |
    #   p_local (3P) | p_local_norm (P) | nb_p_local (3P) | nb_pl_norm (P) |
    #   nb_pg_norm (P)]
    nd, ed = node_dim, edge_dim
    W1 = params['W1']
    w1_hv = _pad_to(W1[:nd], (Hp, Hp)).astype(jnp.bfloat16)
    w1_geo = _pad_to(W1[2 * nd + ed: 2 * nd + ed + G], (G, Hp)).astype(jnp.bfloat16)
    w1_edge = _pad_to(
        jnp.concatenate([W1[nd: 2 * nd + ed], W1[2 * nd + ed + G:]], axis=0),
        (De, Hp)).astype(jnp.bfloat16)

    weights = [
        w1_hv, w1_geo, w1_edge,
        _pad_to(params['b1'], (1, Hp)),                               # b1 (f32)
        _pad_to(params['W2'], (Hp, Hp)).astype(jnp.bfloat16),         # w2
        _pad_to(params['b2'], (1, Hp)),                               # b2
        _pad_to(params['W3'], (Hp, Hp)).astype(jnp.bfloat16),         # w3
        _pad_to(params['b3'], (1, Hp)),                               # b3
        _pad_to(params['g0'], (1, Hp)),                               # LN0 gamma
        _pad_to(params['be0'], (1, Hp)),                              # LN0 beta
        _pad_to(params['Wd1'], (Hp, H4p)).astype(jnp.bfloat16),       # wd1
        _pad_to(params['bd1'], (1, H4p)),                             # bd1
        _pad_to(params['Wd2'], (H4p, Hp)).astype(jnp.bfloat16),       # wd2
        _pad_to(params['bd2'], (1, Hp)),                              # bd2
        _pad_to(params['g1'], (1, Hp)),                               # LN1 gamma
        _pad_to(params['be1'], (1, Hp)),                              # LN1 beta
    ]

    out = run_node_update(msg, hv, geo, es, mv, weights, h_real=H, TM=TM)
    h_V_out = out[:M, :H].reshape(B, L, H)
    return h_V_out, h_E          # edge_update=False: h_E unchanged


# ----------------------------------------------------------------------------
# Pure-JAX f32 reference of the full forward (mirrors the PyTorch module)
# ----------------------------------------------------------------------------
def reference_forward(params, h_V, h_E, E_idx, X, mask_V, mask_attend,
                      n_points=8, position_scale=10.0):
    B, L, nd = h_V.shape
    K = E_idx.shape[-1]
    P = n_points

    N_at, CA, C_at = X[..., 0, :], X[..., 1, :], X[..., 2, :]
    R, t = frames_from_3_points(N_at, CA, C_at)
    t = t / position_scale
    p_local = (h_V @ params['Wp'] + params['bp']).reshape(B, L, P, 3)
    p_global = jnp.einsum('blij,blpj->blpi', R, p_local) + t[:, :, None, :]

    b_idx = jnp.arange(B)[:, None, None]
    nb_pg = p_global[b_idx, E_idx]
    nb_hV = h_V[b_idx, E_idx]
    pg_exp = jnp.broadcast_to(p_global[:, :, None], (B, L, K, P, 3))
    pl_exp = jnp.broadcast_to(p_local[:, :, None], (B, L, K, P, 3))
    pl_norm = jnp.sqrt(jnp.sum(pl_exp ** 2, axis=-1) + 1e-8)
    nb_pl = jnp.einsum('blji,blkpj->blkpi', R, nb_pg - t[:, :, None, None, :])
    nb_pl_norm = jnp.sqrt(jnp.sum(nb_pl ** 2, axis=-1) + 1e-8)
    nb_pg_norm = jnp.sqrt(jnp.sum((pg_exp - nb_pg) ** 2, axis=-1) + 1e-8)
    node_expand = jnp.broadcast_to(h_V[:, :, None, :], (B, L, K, nd))
    msg = jnp.concatenate([
        node_expand, h_E, nb_hV,
        pl_exp.reshape(B, L, K, 3 * P), pl_norm,
        nb_pl.reshape(B, L, K, 3 * P), nb_pl_norm, nb_pg_norm], axis=-1)

    def ln(v, g, b, eps=1e-5):
        mu = jnp.mean(v, axis=-1, keepdims=True)
        var = jnp.mean((v - mu) ** 2, axis=-1, keepdims=True)
        return (v - mu) / jnp.sqrt(var + eps) * g + b

    h = jnp.maximum(msg @ params['W1'] + params['b1'], 0.0)
    h = jnp.maximum(h @ params['W2'] + params['b2'], 0.0)
    m = h @ params['W3'] + params['b3']
    m = m * mask_attend[..., None]
    node_m = jnp.mean(m, axis=-2)
    hv1 = ln(h_V + node_m, params['g0'][0], params['be0'][0])
    d = jnp.maximum(hv1 @ params['Wd1'] + params['bd1'], 0.0)
    d = d @ params['Wd2'] + params['bd2']
    hv2 = ln(hv1 + d, params['g1'][0], params['be1'][0])
    return hv2 * mask_V[..., None]


# ----------------------------------------------------------------------------
# Deterministic parameter init (PyTorch Linear-style uniform)
# ----------------------------------------------------------------------------
def linear_params(key, fan_in, fan_out):
    kw, kb = jax.random.split(key)
    bound = 1.0 / math.sqrt(fan_in)
    W = jax.random.uniform(kw, (fan_in, fan_out), jnp.float32, -bound, bound)
    b = jax.random.uniform(kb, (1, fan_out), jnp.float32, -bound, bound)
    return W, b


def init_params(key, node_dim, edge_dim, hidden_dim, n_points):
    Dm = 2 * node_dim + edge_dim + 9 * n_points
    ks = jax.random.split(key, 8)
    p = {}
    p['Wp'], p['bp'] = linear_params(ks[0], node_dim, n_points * 3)
    p['W1'], p['b1'] = linear_params(ks[1], Dm, hidden_dim)
    p['W2'], p['b2'] = linear_params(ks[2], hidden_dim, hidden_dim)
    p['W3'], p['b3'] = linear_params(ks[3], hidden_dim, hidden_dim)
    p['Wd1'], p['bd1'] = linear_params(ks[4], hidden_dim, hidden_dim * 4)
    p['Wd2'], p['bd2'] = linear_params(ks[5], hidden_dim * 4, hidden_dim)
    # LayerNorm params (PyTorch default init: gamma=1, beta=0)
    p['g0'] = jnp.ones((1, hidden_dim), jnp.float32)
    p['be0'] = jnp.zeros((1, hidden_dim), jnp.float32)
    p['g1'] = jnp.ones((1, hidden_dim), jnp.float32)
    p['be1'] = jnp.zeros((1, hidden_dim), jnp.float32)
    return p


if __name__ == "__main__":
    B, L, K = 2, 8, 4
    node_dim = edge_dim = hidden_dim = 32
    n_points = 8

    key = jax.random.PRNGKey(0)
    k_hv, k_he, k_ei, k_x, k_mv, k_ma, k_p = jax.random.split(key, 7)

    h_V = jax.random.normal(k_hv, (B, L, node_dim), jnp.float32)
    h_E = jax.random.normal(k_he, (B, L, K, edge_dim), jnp.float32)
    E_idx = jax.random.randint(k_ei, (B, L, K), 0, L, jnp.int32)
    X = jax.random.normal(k_x, (B, L, 3, 3), jnp.float32) * 3.0
    mask_V = (jax.random.uniform(k_mv, (B, L)) > 0.2).astype(jnp.float32)
    mask_attend = (jax.random.uniform(k_ma, (B, L, K)) > 0.2).astype(jnp.float32)

    params = init_params(k_p, node_dim, edge_dim, hidden_dim, n_points)

    h_V_out, h_E_out = ipmp_forward(params, h_V, h_E, E_idx, X, mask_V,
                                    mask_attend, n_points=n_points,
                                    position_scale=10.0)
    jax.block_until_ready(h_V_out)

    # correctness check vs pure-JAX f32 reference (kernel uses bf16 MXU inputs)
    ref = reference_forward(params, h_V, h_E, E_idx, X, mask_V, mask_attend,
                            n_points=n_points, position_scale=10.0)
    assert h_V_out.shape == ref.shape
    assert jnp.allclose(h_V_out, ref, atol=5e-2, rtol=5e-2), \
        f"mismatch vs reference (max abs diff {float(jnp.max(jnp.abs(h_V_out - ref)))})"

    print("KERNEL_OK")
</pallas_src>

<mosaic_0001>
module attributes {stable_mosaic.version = 11 : i64} {
  func.func @ipmp_node_kernel(%arg0: i32, %arg1: memref<4x16x104xbf16, #tpu.memory_space<vmem>>, %arg2: memref<16x128xf32, #tpu.memory_space<vmem>>, %arg3: memref<16x32xf32, #tpu.memory_space<vmem>>, %arg4: memref<4x16x1xf32, #tpu.memory_space<vmem>>, %arg5: memref<16x1xf32, #tpu.memory_space<vmem>>, %arg6: memref<128x128xbf16, #tpu.memory_space<vmem>>, %arg7: memref<32x128xbf16, #tpu.memory_space<vmem>>, %arg8: memref<104x128xbf16, #tpu.memory_space<vmem>>, %arg9: memref<1x128xf32, #tpu.memory_space<vmem>>, %arg10: memref<128x128xbf16, #tpu.memory_space<vmem>>, %arg11: memref<1x128xf32, #tpu.memory_space<vmem>>, %arg12: memref<128x128xbf16, #tpu.memory_space<vmem>>, %arg13: memref<1x128xf32, #tpu.memory_space<vmem>>, %arg14: memref<1x128xf32, #tpu.memory_space<vmem>>, %arg15: memref<1x128xf32, #tpu.memory_space<vmem>>, %arg16: memref<128x128xbf16, #tpu.memory_space<vmem>>, %arg17: memref<1x128xf32, #tpu.memory_space<vmem>>, %arg18: memref<128x128xbf16, #tpu.memory_space<vmem>>, %arg19: memref<1x128xf32, #tpu.memory_space<vmem>>, %arg20: memref<1x128xf32, #tpu.memory_space<vmem>>, %arg21: memref<1x128xf32, #tpu.memory_space<vmem>>, %arg22: memref<16x128xf32, #tpu.memory_space<vmem>>) attributes {dimension_semantics = [#tpu.dimension_semantics<parallel>], iteration_bounds = array<i64: 1>, scalar_prefetch = 0 : i64, scratch_operands = 0 : i64, tpu.core_type = #tpu.core_type<tc>, window_params = [{transform_indices = @transform_0, window_bounds = array<i64: 4, 16, 104>}, {transform_indices = @transform_1, window_bounds = array<i64: 16, 128>}, {transform_indices = @transform_2, window_bounds = array<i64: 16, 32>}, {transform_indices = @transform_3, window_bounds = array<i64: 4, 16, 1>}, {transform_indices = @transform_4, window_bounds = array<i64: 16, 1>}, {pipeline_mode = #tpu.pipeline_mode<synchronous>, transform_indices = @transform_5, window_bounds = array<i64: 128, 128>}, {pipeline_mode = #tpu.pipeline_mode<synchronous>, transform_indices = @transform_6, window_bounds = array<i64: 32, 128>}, {pipeline_mode = #tpu.pipeline_mode<synchronous>, transform_indices = @transform_7, window_bounds = array<i64: 104, 128>}, {pipeline_mode = #tpu.pipeline_mode<synchronous>, transform_indices = @transform_8, window_bounds = array<i64: 1, 128>}, {pipeline_mode = #tpu.pipeline_mode<synchronous>, transform_indices = @transform_9, window_bounds = array<i64: 128, 128>}, {pipeline_mode = #tpu.pipeline_mode<synchronous>, transform_indices = @transform_10, window_bounds = array<i64: 1, 128>}, {pipeline_mode = #tpu.pipeline_mode<synchronous>, transform_indices = @transform_11, window_bounds = array<i64: 128, 128>}, {pipeline_mode = #tpu.pipeline_mode<synchronous>, transform_indices = @transform_12, window_bounds = array<i64: 1, 128>}, {pipeline_mode = #tpu.pipeline_mode<synchronous>, transform_indices = @transform_13, window_bounds = array<i64: 1, 128>}, {pipeline_mode = #tpu.pipeline_mode<synchronous>, transform_indices = @transform_14, window_bounds = array<i64: 1, 128>}, {pipeline_mode = #tpu.pipeline_mode<synchronous>, transform_indices = @transform_15, window_bounds = array<i64: 128, 128>}, {pipeline_mode = #tpu.pipeline_mode<synchronous>, transform_indices = @transform_16, window_bounds = array<i64: 1, 128>}, {pipeline_mode = #tpu.pipeline_mode<synchronous>, transform_indices = @transform_17, window_bounds = array<i64: 128, 128>}, {pipeline_mode = #tpu.pipeline_mode<synchronous>, transform_indices = @transform_18, window_bounds = array<i64: 1, 128>}, {pipeline_mode = #tpu.pipeline_mode<synchronous>, transform_indices = @transform_19, window_bounds = array<i64: 1, 128>}, {pipeline_mode = #tpu.pipeline_mode<synchronous>, transform_indices = @transform_20, window_bounds = array<i64: 1, 128>}, {transform_indices = @transform_21, window_bounds = array<i64: 16, 128>}]} {
    %c0 = arith.constant 0 : index
    %c0_0 = arith.constant 0 : index
    %0 = vector.load %arg2[%c0, %c0_0] : memref<16x128xf32, #tpu.memory_space<vmem>>, vector<16x128xf32>
    %1 = arith.truncf %0 : vector<16x128xf32> to vector<16x128xbf16>
    %c0_1 = arith.constant 0 : index
    %c0_2 = arith.constant 0 : index
    %2 = vector.load %arg6[%c0_1, %c0_2] : memref<128x128xbf16, #tpu.memory_space<vmem>>, vector<128x128xbf16>
    %cst = arith.constant dense<0.000000e+00> : vector<16x128xf32>
    %3 = tpu.matmul %1, %2, %cst {dimension_numbers = #tpu.dot_dimension_numbers<[1], [0], [0], [1], [0, 0, 1, 1], [], []>} : vector<16x128xbf16>, vector<128x128xbf16>, vector<16x128xf32> -> vector<16x128xf32>
    %c0_3 = arith.constant 0 : index
    %c0_4 = arith.constant 0 : index
    %4 = vector.load %arg3[%c0_3, %c0_4] : memref<16x32xf32, #tpu.memory_space<vmem>>, vector<16x32xf32>
    %5 = arith.truncf %4 : vector<16x32xf32> to vector<16x32xbf16>
    %c0_5 = arith.constant 0 : index
    %c0_6 = arith.constant 0 : index
    %6 = vector.load %arg7[%c0_5, %c0_6] : memref<32x128xbf16, #tpu.memory_space<vmem>>, vector<32x128xbf16>
    %cst_7 = arith.constant dense<0.000000e+00> : vector<16x128xf32>
    %7 = tpu.matmul %5, %6, %cst_7 {dimension_numbers = #tpu.dot_dimension_numbers<[1], [0], [0], [1], [0, 0, 1, 1], [], []>} : vector<16x32xbf16>, vector<32x128xbf16>, vector<16x128xf32> -> vector<16x128xf32>
    %8 = arith.addf %3, %7 : vector<16x128xf32>
    %c0_8 = arith.constant 0 : index
    %c0_9 = arith.constant 0 : index
    %9 = vector.load %arg9[%c0_8, %c0_9] : memref<1x128xf32, #tpu.memory_space<vmem>>, vector<1x128xf32>
    %10 = vector.broadcast %9 : vector<1x128xf32> to vector<16x128xf32>
    %11 = arith.addf %8, %10 : vector<16x128xf32>
    %c0_10 = arith.constant 0 : index
    %c0_11 = arith.constant 0 : index
    %c0_12 = arith.constant 0 : index
    %12 = vector.load %arg1[%c0_10, %c0_11, %c0_12] : memref<4x16x104xbf16, #tpu.memory_space<vmem>>, vector<4x16x104xbf16>
    %13 = vector.shape_cast %12 : vector<4x16x104xbf16> to vector<64x104xbf16>
    %c0_13 = arith.constant 0 : index
    %c0_14 = arith.constant 0 : index
    %14 = vector.load %arg8[%c0_13, %c0_14] : memref<104x128xbf16, #tpu.memory_space<vmem>>, vector<104x128xbf16>
    %cst_15 = arith.constant dense<0.000000e+00> : vector<64x128xf32>
    %15 = tpu.matmul %13, %14, %cst_15 {dimension_numbers = #tpu.dot_dimension_numbers<[1], [0], [0], [1], [0, 0, 1, 1], [], []>} : vector<64x104xbf16>, vector<104x128xbf16>, vector<64x128xf32> -> vector<64x128xf32>
    %16 = vector.shape_cast %15 : vector<64x128xf32> to vector<4x16x128xf32>
    %17 = vector.shape_cast %11 : vector<16x128xf32> to vector<1x16x128xf32>
    %18 = vector.broadcast %17 : vector<1x16x128xf32> to vector<4x16x128xf32>
    %19 = arith.addf %16, %18 : vector<4x16x128xf32>
    %cst_16 = arith.constant 0.000000e+00 : f32
    %20 = vector.broadcast %cst_16 : f32 to vector<4x16x128xf32>
    %21 = arith.maximumf %19, %20 : vector<4x16x128xf32>
    %22 = vector.shape_cast %21 : vector<4x16x128xf32> to vector<64x128xf32>
    %23 = arith.truncf %22 : vector<64x128xf32> to vector<64x128xbf16>
    %c0_17 = arith.constant 0 : index
    %c0_18 = arith.constant 0 : index
    %24 = vector.load %arg10[%c0_17, %c0_18] : memref<128x128xbf16, #tpu.memory_space<vmem>>, vector<128x128xbf16>
    %cst_19 = arith.constant dense<0.000000e+00> : vector<64x128xf32>
    %25 = tpu.matmul %23, %24, %cst_19 {dimension_numbers = #tpu.dot_dimension_numbers<[1], [0], [0], [1], [0, 0, 1, 1], [], []>} : vector<64x128xbf16>, vector<128x128xbf16>, vector<64x128xf32> -> vector<64x128xf32>
    %c0_20 = arith.constant 0 : index
    %c0_21 = arith.constant 0 : index
    %26 = vector.load %arg11[%c0_20, %c0_21] : memref<1x128xf32, #tpu.memory_space<vmem>>, vector<1x128xf32>
    %27 = vector.broadcast %26 : vector<1x128xf32> to vector<64x128xf32>
    %28 = arith.addf %25, %27 : vector<64x128xf32>
    %cst_22 = arith.constant 0.000000e+00 : f32
    %29 = vector.broadcast %cst_22 : f32 to vector<64x128xf32>
    %30 = arith.maximumf %28, %29 : vector<64x128xf32>
    %c0_23 = arith.constant 0 : index
    %c0_24 = arith.constant 0 : index
    %c0_25 = arith.constant 0 : index
    %31 = vector.load %arg4[%c0_23, %c0_24, %c0_25] : memref<4x16x1xf32, #tpu.memory_space<vmem>>, vector<4x16x1xf32>
    %32 = vector.shape_cast %30 : vector<64x128xf32> to vector<4x16x128xf32>
    %33 = vector.broadcast %31 : vector<4x16x1xf32> to vector<4x16x128xf32>
    %34 = arith.mulf %32, %33 : vector<4x16x128xf32>
    %cst_26 = arith.constant dense<0.000000e+00> : vector<16x128xf32>
    %35 = vector.multi_reduction <add>, %34, %cst_26 [0] : vector<4x16x128xf32> to vector<16x128xf32>
    %cst_27 = arith.constant dense<0.000000e+00> : vector<16x1xf32>
    %36 = vector.multi_reduction <add>, %31, %cst_27 [0] : vector<4x16x1xf32> to vector<16x1xf32>
    %37 = arith.truncf %35 : vector<16x128xf32> to vector<16x128xbf16>
    %c0_28 = arith.constant 0 : index
    %c0_29 = arith.constant 0 : index
    %38 = vector.load %arg12[%c0_28, %c0_29] : memref<128x128xbf16, #tpu.memory_space<vmem>>, vector<128x128xbf16>
    %cst_30 = arith.constant dense<0.000000e+00> : vector<16x128xf32>
    %39 = tpu.matmul %37, %38, %cst_30 {dimension_numbers = #tpu.dot_dimension_numbers<[1], [0], [0], [1], [0, 0, 1, 1], [], []>} : vector<16x128xbf16>, vector<128x128xbf16>, vector<16x128xf32> -> vector<16x128xf32>
    %c0_31 = arith.constant 0 : index
    %c0_32 = arith.constant 0 : index
    %40 = vector.load %arg13[%c0_31, %c0_32] : memref<1x128xf32, #tpu.memory_space<vmem>>, vector<1x128xf32>
    %41 = vector.broadcast %40 : vector<1x128xf32> to vector<16x128xf32>
    %42 = vector.broadcast %36 : vector<16x1xf32> to vector<16x128xf32>
    %43 = arith.mulf %41, %42 : vector<16x128xf32>
    %44 = arith.addf %39, %43 : vector<16x128xf32>
    %45 = tpu.iota {dimensions = array<i32: 1>} : vector<1x128xi32>
    %c32_i32 = arith.constant 32 : i32
    %46 = vector.broadcast %c32_i32 : i32 to vector<1x128xi32>
    %47 = arith.cmpi slt, %45, %46 : vector<1x128xi32>
    %48 = arith.extui %47 : vector<1x128xi1> to vector<1x128xi32>
    %49 = arith.sitofp %48 : vector<1x128xi32> to vector<1x128xf32>
    %50 = arith.addf %0, %44 : vector<16x128xf32>
    %c0_33 = arith.constant 0 : index
    %c0_34 = arith.constant 0 : index
    %51 = vector.load %arg14[%c0_33, %c0_34] : memref<1x128xf32, #tpu.memory_space<vmem>>, vector<1x128xf32>
    %c0_35 = arith.constant 0 : index
    %c0_36 = arith.constant 0 : index
    %52 = vector.load %arg15[%c0_35, %c0_36] : memref<1x128xf32, #tpu.memory_space<vmem>>, vector<1x128xf32>
    %cst_37 = arith.constant dense<0.000000e+00> : vector<16xf32>
    %53 = vector.multi_reduction <add>, %50, %cst_37 [1] : vector<16x128xf32> to vector<16xf32>
    %54 = vector.shape_cast %53 : vector<16xf32> to vector<16x1xf32>
    %cst_38 = arith.constant 3.125000e-02 : f32
    %55 = vector.broadcast %cst_38 : f32 to vector<16x1xf32>
    %56 = arith.mulf %54, %55 : vector<16x1xf32>
    %57 = vector.broadcast %56 : vector<16x1xf32> to vector<16x128xf32>
    %58 = arith.subf %50, %57 : vector<16x128xf32>
    %59 = vector.broadcast %49 : vector<1x128xf32> to vector<16x128xf32>
    %60 = arith.mulf %58, %59 : vector<16x128xf32>
    %61 = arith.mulf %60, %60 : vector<16x128xf32>
    %cst_39 = arith.constant dense<0.000000e+00> : vector<16xf32>
    %62 = vector.multi_reduction <add>, %61, %cst_39 [1] : vector<16x128xf32> to vector<16xf32>
    %63 = vector.shape_cast %62 : vector<16xf32> to vector<16x1xf32>
    %cst_40 = arith.constant 3.125000e-02 : f32
    %64 = vector.broadcast %cst_40 : f32 to vector<16x1xf32>
    %65 = arith.mulf %63, %64 : vector<16x1xf32>
    %cst_41 = arith.constant 9.99999974E-6 : f32
    %66 = vector.broadcast %cst_41 : f32 to vector<16x1xf32>
    %67 = arith.addf %65, %66 : vector<16x1xf32>
    %68 = math.rsqrt %67 : vector<16x1xf32>
    %69 = vector.broadcast %68 : vector<16x1xf32> to vector<16x128xf32>
    %70 = arith.mulf %60, %69 : vector<16x128xf32>
    %71 = vector.broadcast %51 : vector<1x128xf32> to vector<16x128xf32>
    %72 = arith.mulf %70, %71 : vector<16x128xf32>
    %73 = vector.broadcast %52 : vector<1x128xf32> to vector<16x128xf32>
    %74 = arith.addf %72, %73 : vector<16x128xf32>
    %75 = arith.truncf %74 : vector<16x128xf32> to vector<16x128xbf16>
    %c0_42 = arith.constant 0 : index
    %c0_43 = arith.constant 0 : index
    %76 = vector.load %arg16[%c0_42, %c0_43] : memref<128x128xbf16, #tpu.memory_space<vmem>>, vector<128x128xbf16>
    %cst_44 = arith.constant dense<0.000000e+00> : vector<16x128xf32>
    %77 = tpu.matmul %75, %76, %cst_44 {dimension_numbers = #tpu.dot_dimension_numbers<[1], [0], [0], [1], [0, 0, 1, 1], [], []>} : vector<16x128xbf16>, vector<128x128xbf16>, vector<16x128xf32> -> vector<16x128xf32>
    %c0_45 = arith.constant 0 : index
    %c0_46 = arith.constant 0 : index
    %78 = vector.load %arg17[%c0_45, %c0_46] : memref<1x128xf32, #tpu.memory_space<vmem>>, vector<1x128xf32>
    %79 = vector.broadcast %78 : vector<1x128xf32> to vector<16x128xf32>
    %80 = arith.addf %77, %79 : vector<16x128xf32>
    %cst_47 = arith.constant 0.000000e+00 : f32
    %81 = vector.broadcast %cst_47 : f32 to vector<16x128xf32>
    %82 = arith.maximumf %80, %81 : vector<16x128xf32>
    %83 = arith.truncf %82 : vector<16x128xf32> to vector<16x128xbf16>
    %c0_48 = arith.constant 0 : index
    %c0_49 = arith.constant 0 : index
    %84 = vector.load %arg18[%c0_48, %c0_49] : memref<128x128xbf16, #tpu.memory_space<vmem>>, vector<128x128xbf16>
    %cst_50 = arith.constant dense<0.000000e+00> : vector<16x128xf32>
    %85 = tpu.matmul %83, %84, %cst_50 {dimension_numbers = #tpu.dot_dimension_numbers<[1], [0], [0], [1], [0, 0, 1, 1], [], []>} : vector<16x128xbf16>, vector<128x128xbf16>, vector<16x128xf32> -> vector<16x128xf32>
    %c0_51 = arith.constant 0 : index
    %c0_52 = arith.constant 0 : index
    %86 = vector.load %arg19[%c0_51, %c0_52] : memref<1x128xf32, #tpu.memory_space<vmem>>, vector<1x128xf32>
    %87 = vector.broadcast %86 : vector<1x128xf32> to vector<16x128xf32>
    %88 = arith.addf %85, %87 : vector<16x128xf32>
    %89 = arith.addf %74, %88 : vector<16x128xf32>
    %c0_53 = arith.constant 0 : index
    %c0_54 = arith.constant 0 : index
    %90 = vector.load %arg20[%c0_53, %c0_54] : memref<1x128xf32, #tpu.memory_space<vmem>>, vector<1x128xf32>
    %c0_55 = arith.constant 0 : index
    %c0_56 = arith.constant 0 : index
    %91 = vector.load %arg21[%c0_55, %c0_56] : memref<1x128xf32, #tpu.memory_space<vmem>>, vector<1x128xf32>
    %cst_57 = arith.constant dense<0.000000e+00> : vector<16xf32>
    %92 = vector.multi_reduction <add>, %89, %cst_57 [1] : vector<16x128xf32> to vector<16xf32>
    %93 = vector.shape_cast %92 : vector<16xf32> to vector<16x1xf32>
    %cst_58 = arith.constant 3.125000e-02 : f32
    %94 = vector.broadcast %cst_58 : f32 to vector<16x1xf32>
    %95 = arith.mulf %93, %94 : vector<16x1xf32>
    %96 = vector.broadcast %95 : vector<16x1xf32> to vector<16x128xf32>
    %97 = arith.subf %89, %96 : vector<16x128xf32>
    %98 = vector.broadcast %49 : vector<1x128xf32> to vector<16x128xf32>
    %99 = arith.mulf %97, %98 : vector<16x128xf32>
    %100 = arith.mulf %99, %99 : vector<16x128xf32>
    %cst_59 = arith.constant dense<0.000000e+00> : vector<16xf32>
    %101 = vector.multi_reduction <add>, %100, %cst_59 [1] : vector<16x128xf32> to vector<16xf32>
    %102 = vector.shape_cast %101 : vector<16xf32> to vector<16x1xf32>
    %cst_60 = arith.constant 3.125000e-02 : f32
    %103 = vector.broadcast %cst_60 : f32 to vector<16x1xf32>
    %104 = arith.mulf %102, %103 : vector<16x1xf32>
    %cst_61 = arith.constant 9.99999974E-6 : f32
    %105 = vector.broadcast %cst_61 : f32 to vector<16x1xf32>
    %106 = arith.addf %104, %105 : vector<16x1xf32>
    %107 = math.rsqrt %106 : vector<16x1xf32>
    %108 = vector.broadcast %107 : vector<16x1xf32> to vector<16x128xf32>
    %109 = arith.mulf %99, %108 : vector<16x128xf32>
    %110 = vector.broadcast %90 : vector<1x128xf32> to vector<16x128xf32>
    %111 = arith.mulf %109, %110 : vector<16x128xf32>
    %112 = vector.broadcast %91 : vector<1x128xf32> to vector<16x128xf32>
    %113 = arith.addf %111, %112 : vector<16x128xf32>
    %c0_62 = arith.constant 0 : index
    %c0_63 = arith.constant 0 : index
    %114 = vector.load %arg5[%c0_62, %c0_63] : memref<16x1xf32, #tpu.memory_space<vmem>>, vector<16x1xf32>
    %115 = vector.broadcast %114 : vector<16x1xf32> to vector<16x128xf32>
    %116 = arith.mulf %113, %115 : vector<16x128xf32>
    %c0_64 = arith.constant 0 : index
    %c0_65 = arith.constant 0 : index
    %117 = vector.load %arg22[%c0_64, %c0_65] : memref<16x128xf32, #tpu.memory_space<vmem>>, vector<16x128xf32>
    tpu.vector_store %arg22[%c0_64, %c0_65], %116 {strides = array<i32>} : memref<16x128xf32, #tpu.memory_space<vmem>>, vector<16x128xf32>,
    return
  }
  func.func @transform_0(%arg0: i32) -> (i32, i32, i32) {
    %c0_i32 = arith.constant 0 : i32
    %c0_i32_0 = arith.constant 0 : i32
    %c0_i32_1 = arith.constant 0 : i32
    return %c0_i32, %arg0, %c0_i32_0 : i32, i32, i32
  }
  func.func @transform_1(%arg0: i32) -> (i32, i32) {
    %c0_i32 = arith.constant 0 : i32
    %c0_i32_0 = arith.constant 0 : i32
    return %arg0, %c0_i32 : i32, i32
  }
  func.func @transform_2(%arg0: i32) -> (i32, i32) {
    %c0_i32 = arith.constant 0 : i32
    %c0_i32_0 = arith.constant 0 : i32
    return %arg0, %c0_i32 : i32, i32
  }
  func.func @transform_3(%arg0: i32) -> (i32, i32, i32) {
    %c0_i32 = arith.constant 0 : i32
    %c0_i32_0 = arith.constant 0 : i32
    %c0_i32_1 = arith.constant 0 : i32
    return %c0_i32, %arg0, %c0_i32_0 : i32, i32, i32
  }
  func.func @transform_4(%arg0: i32) -> (i32, i32) {
    %c0_i32 = arith.constant 0 : i32
    %c0_i32_0 = arith.constant 0 : i32
    return %arg0, %c0_i32 : i32, i32
  }
  func.func @transform_5(%arg0: i32) -> (i32, i32) {
    %c0_i32 = arith.constant 0 : i32
    %c0_i32_0 = arith.constant 0 : i32
    %c0_i32_1 = arith.constant 0 : i32
    return %c0_i32, %c0_i32_0 : i32, i32
  }
  func.func @transform_6(%arg0: i32) -> (i32, i32) {
    %c0_i32 = arith.constant 0 : i32
    %c0_i32_0 = arith.constant 0 : i32
    %c0_i32_1 = arith.constant 0 : i32
    return %c0_i32, %c0_i32_0 : i32, i32
  }
  func.func @transform_7(%arg0: i32) -> (i32, i32) {
    %c0_i32 = arith.constant 0 : i32
    %c0_i32_0 = arith.constant 0 : i32
    %c0_i32_1 = arith.constant 0 : i32
    return %c0_i32, %c0_i32_0 : i32, i32
  }
  func.func @transform_8(%arg0: i32) -> (i32, i32) {
    %c0_i32 = arith.constant 0 : i32
    %c0_i32_0 = arith.constant 0 : i32
    %c0_i32_1 = arith.constant 0 : i32
    return %c0_i32, %c0_i32_0 : i32, i32
  }
  func.func @transform_9(%arg0: i32) -> (i32, i32) {
    %c0_i32 = arith.constant 0 : i32
    %c0_i32_0 = arith.constant 0 : i32
    %c0_i32_1 = arith.constant 0 : i32
    return %c0_i32, %c0_i32_0 : i32, i32
  }
  func.func @transform_10(%arg0: i32) -> (i32, i32) {
    %c0_i32 = arith.constant 0 : i32
    %c0_i32_0 = arith.constant 0 : i32
    %c0_i32_1 = arith.constant 0 : i32
    return %c0_i32, %c0_i32_0 : i32, i32
  }
  func.func @transform_11(%arg0: i32) -> (i32, i32) {
    %c0_i32 = arith.constant 0 : i32
    %c0_i32_0 = arith.constant 0 : i32
    %c0_i32_1 = arith.constant 0 : i32
    return %c0_i32, %c0_i32_0 : i32, i32
  }
  func.func @transform_12(%arg0: i32) -> (i32, i32) {
    %c0_i32 = arith.constant 0 : i32
    %c0_i32_0 = arith.constant 0 : i32
    %c0_i32_1 = arith.constant 0 : i32
    return %c0_i32, %c0_i32_0 : i32, i32
  }
  func.func @transform_13(%arg0: i32) -> (i32, i32) {
    %c0_i32 = arith.constant 0 : i32
    %c0_i32_0 = arith.constant 0 : i32
    %c0_i32_1 = arith.constant 0 : i32
    return %c0_i32, %c0_i32_0 : i32, i32
  }
  func.func @transform_14(%arg0: i32) -> (i32, i32) {
    %c0_i32 = arith.constant 0 : i32
    %c0_i32_0 = arith.constant 0 : i32
    %c0_i32_1 = arith.constant 0 : i32
    return %c0_i32, %c0_i32_0 : i32, i32
  }
  func.func @transform_15(%arg0: i32) -> (i32, i32) {
    %c0_i32 = arith.constant 0 : i32
    %c0_i32_0 = arith.constant 0 : i32
    %c0_i32_1 = arith.constant 0 : i32
    return %c0_i32, %c0_i32_0 : i32, i32
  }
  func.func @transform_16(%arg0: i32) -> (i32, i32) {
    %c0_i32 = arith.constant 0 : i32
    %c0_i32_0 = arith.constant 0 : i32
    %c0_i32_1 = arith.constant 0 : i32
    return %c0_i32, %c0_i32_0 : i32, i32
  }
  func.func @transform_17(%arg0: i32) -> (i32, i32) {
    %c0_i32 = arith.constant 0 : i32
    %c0_i32_0 = arith.constant 0 : i32
    %c0_i32_1 = arith.constant 0 : i32
    return %c0_i32, %c0_i32_0 : i32, i32
  }
  func.func @transform_18(%arg0: i32) -> (i32, i32) {
    %c0_i32 = arith.constant 0 : i32
    %c0_i32_0 = arith.constant 0 : i32
    %c0_i32_1 = arith.constant 0 : i32
    return %c0_i32, %c0_i32_0 : i32, i32
  }
  func.func @transform_19(%arg0: i32) -> (i32, i32) {
    %c0_i32 = arith.constant 0 : i32
    %c0_i32_0 = arith.constant 0 : i32
    %c0_i32_1 = arith.constant 0 : i32
    return %c0_i32, %c0_i32_0 : i32, i32
  }
  func.func @transform_20(%arg0: i32) -> (i32, i32) {
    %c0_i32 = arith.constant 0 : i32
    %c0_i32_0 = arith.constant 0 : i32
    %c0_i32_1 = arith.constant 0 : i32
    return %c0_i32, %c0_i32_0 : i32, i32
  }
  func.func @transform_21(%arg0: i32) -> (i32, i32) {
    %c0_i32 = arith.constant 0 : i32
    %c0_i32_0 = arith.constant 0 : i32
    return %arg0, %c0_i32 : i32, i32
  }
}

</mosaic_0001>

<bundles_post_ra>
// kernel: tpu_custom_call.1
= control target key start
LH: loop header
LB: loop body
LE: loop exit
PB: predicated region body
PF: predicated region fallthrough
CT: control target
= control target key end

     0   :  { %s2283_s0 = inlined_call_operand.hbm [shape: bf16[4,16,104], index: 0, kind: input, shape index: {}]   ;;  %s2284_s1 = inlined_call_operand.hbm [shape: f32[16,128], index: 1, kind: input, shape index: {}]   ;;  %s2285_s2 = inlined_call_operand.hbm [shape: f32[16,32], index: 2, kind: input, shape index: {}]   ;;  %s2286_s3 = inlined_call_operand.vmem [shape: f32[4,16,1], index: 3, kind: input, shape index: {}]   ;;  %s2287_s4 = inlined_call_operand.vmem [shape: f32[16,1], index: 4, kind: input, shape index: {}]   ;;  %s2288_s5 = inlined_call_operand.vmem [shape: bf16[128,128], index: 5, kind: input, shape index: {}]   ;;  %s2289_s6 = inlined_call_operand.hbm [shape: bf16[32,128], index: 6, kind: input, shape index: {}]   ;;  %s2290_s7 = inlined_call_operand.hbm [shape: bf16[104,128], index: 7, kind: input, shape index: {}]   ;;  %s2291_s8 = inlined_call_operand.vmem [shape: f32[1,128], index: 8, kind: input, shape index: {}]   ;;  %s2292_s9 = inlined_call_operand.hbm [shape: bf16[128,128], index: 9, kind: input, shape index: {}]   ;;  %s2293_s10 = inlined_call_operand.vmem [shape: f32[1,128], index: 10, kind: input, shape index: {}]   ;;  %s2294_s11 = inlined_call_operand.hbm [shape: bf16[128,128], index: 11, kind: input, shape index: {}]   ;;  %s2295_s12 = inlined_call_operand.hbm [shape: f32[1,128], index: 12, kind: input, shape index: {}]   ;;  %s2296_s13 = inlined_call_operand.vmem [shape: f32[1,128], index: 13, kind: input, shape index: {}]   ;;  %s2297_s14 = inlined_call_operand.vmem [shape: f32[1,128], index: 14, kind: input, shape index: {}]   ;;  %s2298_s15 = inlined_call_operand.vmem [shape: bf16[128,128], index: 15, kind: input, shape index: {}]   ;;  %s2299_s16 = inlined_call_operand.vmem [shape: f32[1,128], index: 16, kind: input, shape index: {}]   ;;  %s2300_s17 = inlined_call_operand.hbm [shape: bf16[128,128], index: 17, kind: input, shape index: {}]   ;;  %s2301_s18 = inlined_call_operand.vmem [shape: f32[1,128], index: 18, kind: input, shape index: {}]   ;;  %s2302_s19 = inlined_call_operand.vmem [shape: f32[1,128], index: 19, kind: input, shape index: {}]   ;;  %s2303_s20 = inlined_call_operand.vmem [shape: f32[1,128], index: 20, kind: input, shape index: {}]   ;;  %s2304_s21 = inlined_call_operand.hbm [shape: f32[16,128], index: 21, kind: output, shape index: {}]  }
   0x1   :  { %2312 = sst [smem:[#allocation24_spill]] %s2283_s0 }
   0x2   :  { %2313 = sst [smem:[#allocation25_spill]] %s2284_s1 }
   0x3   :  { %2314 = sst [smem:[#allocation26_spill]] %s2285_s2 }
   0x4   :  { %2315 = sst [smem:[#allocation27_spill]] %s2286_s3 }
   0x5   :  { %2316 = sst [smem:[#allocation28_spill]] %s2287_s4 }
   0x6   :  { %2317 = sst [smem:[#allocation29_spill]] %s2288_s5 }
   0x7   :  { %2318 = sst [smem:[#allocation30_spill]] %s2303_s20 }
   0x8   :  { %2319 = sst [smem:[#allocation31_spill]] %s2304_s21 }
   0x9   :  { %26 = vsyncpa [#allocation3], 0 }
   0xa   :  { %27 = vsyncpa [#allocation6], 0 }
   0xb   :  { %28 = vsyncpa [#allocation9], 0 }
   0xc   :  { %29 = vsyncpa [#allocation12], 0 }
   0xd   :  { %30 = vsyncpa [#allocation15], 0 }
   0xe   :  { %31 = vsyncpa [#allocation4], 0  ;;  %s1834_s2 = smov [#allocation5]   ;;  %s2320_s3 = sld [smem:[#allocation25_spill]] }
   0xf   :  { %s49_s25 = sshll.u32 %s1834_s2, 4  ;;  %s50_s25 = int_to_ptr.vmem [resolvable:$true] %s49_s25 }
  0x14   :  { %s1602_s28 = scalar_lea.hbm %s2320_s3, 256 }
  0x15   :  { %p1603_p0 = scmp.ne.s32.totalorder %s2320_s3, %s1602_s28  ;;  %p1606_p1 = scmp.lt.u32.totalorder %s1602_s28, %s2320_s3 }
  0x17   :  { %p1608_p2 = pnand %p1606_p1, %p1603_p0 }
  0x19   :  { %1611 = shalt.err (!%p1608_p2)
}
  0x1a   :  { %s1612_s5 = scalar_lea.vmem %s50_s25, 256  ;;  %p1617_p4 = scmp.lt.s32.totalorder %s50_s25, %s50_s25 }
  0x1b   :  { %p1613_p3 = scmp.ne.s32.totalorder %s50_s25, %s1612_s5  ;;  %p1618_p5 = scmp.lt.s32.totalorder %s1612_s5, %s1612_s5 }
  0x1d   :  { %p1619_p6 = por %p1618_p5, %p1617_p4 }
  0x1f   :  { %p1620_p7 = pnand %p1619_p6, %p1613_p3 }
  0x21   :  { %1623 = shalt.err (!%p1620_p7)
}
  0x22   :  { %s1835_s22 = smov 128   ;;  %s1836_s23 = smov 8  }
  0x23   :  { %55 = dma.hbm_to_vmem [thread:$0]  %s2320_s3, 256, %s50_s25, [#allocation6], %s1835_s22, %s1835_s22, %s1836_s23  }
  0x24   :  { %s1837_s2 = smov [#allocation8]   ;;  %s1838_s27 = smov [#allocation11]  }
  0x25   :  { %s79_s26 = sshll.u32 %s1837_s2, 4  ;;  %s105_s28 = sshll.u32 %s1838_s27, 4  ;;  %s80_s26 = int_to_ptr.vmem [resolvable:$true] %s79_s26  ;;  %s106_s28 = int_to_ptr.vmem [resolvable:$true] %s105_s28 }
  0x26   :  { %s1624_s4 = scalar_lea.hbm %s2289_s6, 256 }
  0x27   :  { %p1625_p8 = scmp.ne.s32.totalorder %s2289_s6, %s1624_s4  ;;  %p1628_p9 = scmp.lt.u32.totalorder %s1624_s4, %s2289_s6 }
  0x29   :  { %p1630_p10 = pnand %p1628_p9, %p1625_p8 }
  0x2b   :  { %1633 = shalt.err (!%p1630_p10)
}
  0x2c   :  { %s1634_s25 = scalar_lea.vmem %s80_s26, 256  ;;  %p1639_p12 = scmp.lt.s32.totalorder %s80_s26, %s80_s26 }
  0x2d   :  { %p1635_p11 = scmp.ne.s32.totalorder %s80_s26, %s1634_s25  ;;  %p1640_p13 = scmp.lt.s32.totalorder %s1634_s25, %s1634_s25 }
  0x2f   :  { %p1641_p0 = por %p1640_p13, %p1639_p12 }
  0x31   :  { %p1642_p1 = pnand %p1641_p0, %p1635_p11 }
  0x33   :  { %1645 = shalt.err (!%p1642_p1)
}
  0x34   :  { %s1839_s3 = smov 64   ;;  %s1840_s1 = smov 4  }
  0x35   :  { %85 = dma.hbm_to_vmem [thread:$0]  %s2289_s6, 256, %s80_s26, [#allocation9], %s1839_s3, %s1839_s3, %s1840_s1  }
  0x36   :  { %s1646_s27 = scalar_lea.hbm %s2292_s9, 1024 }
  0x37   :  { %p1647_p2 = scmp.ne.s32.totalorder %s2292_s9, %s1646_s27  ;;  %p1650_p3 = scmp.lt.u32.totalorder %s1646_s27, %s2292_s9 }
  0x39   :  { %p1652_p4 = pnand %p1650_p3, %p1647_p2 }
  0x3b   :  { %1655 = shalt.err (!%p1652_p4)
}
  0x3c   :  { %s1656_s5 = scalar_lea.vmem %s106_s28, 1024  ;;  %p1661_p6 = scmp.lt.s32.totalorder %s106_s28, %s106_s28 }
  0x3d   :  { %p1657_p5 = scmp.ne.s32.totalorder %s106_s28, %s1656_s5  ;;  %p1662_p7 = scmp.lt.s32.totalorder %s1656_s5, %s1656_s5 }
  0x3f   :  { %p1663_p8 = por %p1662_p7, %p1661_p6 }
  0x41   :  { %p1664_p9 = pnand %p1663_p8, %p1657_p5 }
  0x43   :  { %1667 = shalt.err (!%p1664_p9)
}
  0x44   :  { %111 = dma.hbm_to_vmem [thread:$0]  %s2292_s9, 1024, %s106_s28, [#allocation12], %s1839_s3, %s1839_s3, %s1840_s1  }
  0x45   :  { %s1841_s25 = smov [#allocation14]   ;;  %s1842_s2 = smov [#allocation2]  }
  0x46   :  { %s132_s24 = sshll.u32 %s1841_s25, 4  ;;  %s37_s20 = sshll.u32 %s1842_s2, 4  ;;  %s133_s24 = int_to_ptr.vmem [resolvable:$true] %s132_s24  ;;  %s38_s20 = int_to_ptr.vmem [resolvable:$true] %s37_s20 }
  0x47   :  { %s1668_s29 = scalar_lea.hbm %s2295_s12, 16 }
  0x48   :  { %p1669_p10 = scmp.ne.s32.totalorder %s2295_s12, %s1668_s29  ;;  %p1672_p11 = scmp.lt.u32.totalorder %s1668_s29, %s2295_s12 }
  0x4a   :  { %p1674_p12 = pnand %p1672_p11, %p1669_p10 }
  0x4c   :  { %1677 = shalt.err (!%p1674_p12)
}
  0x4d   :  { %s1678_s9 = scalar_lea.vmem %s133_s24, 16  ;;  %s1682_s28 = scalar_lea.vmem %s133_s24, 32 }
  0x4e   :  { %p1679_p13 = scmp.ne.s32.totalorder %s133_s24, %s1678_s9  ;;  %p1683_p0 = scmp.lt.s32.totalorder %s133_s24, %s133_s24 }
  0x4f   :  { %p1684_p1 = scmp.lt.s32.totalorder %s1682_s28, %s1678_s9 }
  0x51   :  { %p1685_p2 = por %p1684_p1, %p1683_p0 }
  0x53   :  { %p1686_p3 = pnand %p1685_p2, %p1679_p13 }
  0x55   :  { %1689 = shalt.err (!%p1686_p3)
}
  0x56   :  { %135 = dma.hbm_to_vmem [thread:$0]  %s2295_s12, 16, %s133_s24, [#allocation15]  }
  0x57   :  { %s2321_s21 = sld [smem:[#allocation24_spill]] }
  0x5d   :  { %s1690_s27 = scalar_lea.hbm %s2321_s21, 512 }
  0x5e   :  { %p1691_p4 = scmp.ne.s32.totalorder %s2321_s21, %s1690_s27  ;;  %p1694_p5 = scmp.lt.u32.totalorder %s1690_s27, %s2321_s21 }
  0x60   :  { %p1696_p6 = pnand %p1694_p5, %p1691_p4 }
  0x62   :  { %1699 = shalt.err (!%p1696_p6)
}
  0x63   :  { %s1700_s5 = scalar_lea.vmem %s38_s20, 512  ;;  %p1705_p8 = scmp.lt.s32.totalorder %s38_s20, %s38_s20 }
  0x64   :  { %p1701_p7 = scmp.ne.s32.totalorder %s38_s20, %s1700_s5  ;;  %p1706_p9 = scmp.lt.s32.totalorder %s1700_s5, %s1700_s5 }
  0x66   :  { %p1707_p10 = por %p1706_p9, %p1705_p8 }
  0x68   :  { %p1708_p11 = pnand %p1707_p10, %p1701_p7 }
  0x6a   :  { %1711 = shalt.err (!%p1708_p11)
}
  0x6b   :  { %43 = dma.hbm_to_vmem [thread:$0]  %s2321_s21, 512, %s38_s20, [#allocation3], %s1839_s3, %s1839_s3, %s1840_s1  }
  0x6c   :  { %s1843_s9 = smov [#allocation7]   ;;  %s1844_s6 = smov [#allocation10]  }
  0x6d   :  { %s61_s28 = sshll.u32 %s1843_s9, 4  ;;  %s91_s26 = sshll.u32 %s1844_s6, 4  ;;  %s62_s28 = int_to_ptr.vmem [resolvable:$true] %s61_s28  ;;  %s92_s26 = int_to_ptr.vmem [resolvable:$true] %s91_s26 }
  0x6e   :  { %s2322_s27 = sld [smem:[#allocation26_spill]] }
  0x74   :  { %s1712_s29 = scalar_lea.hbm %s2322_s27, 256 }
  0x75   :  { %p1713_p12 = scmp.ne.s32.totalorder %s2322_s27, %s1712_s29  ;;  %p1716_p13 = scmp.lt.u32.totalorder %s1712_s29, %s2322_s27 }
  0x77   :  { %p1718_p0 = pnand %p1716_p13, %p1713_p12 }
  0x79   :  { %1721 = shalt.err (!%p1718_p0)
}
  0x7a   :  { %s1722_s20 = scalar_lea.vmem %s62_s28, 256  ;;  %p1727_p2 = scmp.lt.s32.totalorder %s62_s28, %s62_s28 }
  0x7b   :  { %p1723_p1 = scmp.ne.s32.totalorder %s62_s28, %s1722_s20  ;;  %p1728_p3 = scmp.lt.s32.totalorder %s1722_s20, %s1722_s20 }
  0x7d   :  { %p1729_p4 = por %p1728_p3, %p1727_p2 }
  0x7f   :  { %p1730_p5 = pnand %p1729_p4, %p1723_p1 }
  0x81   :  { %1733 = shalt.err (!%p1730_p5)
}
  0x82   :  { %67 = dma.hbm_to_vmem [thread:$0]  %s2322_s27, 256, %s62_s28, [#allocation6], %s1835_s22, %s1835_s22, %s1836_s23  }
  0x83   :  { %s1734_s6 = scalar_lea.hbm %s2290_s7, 832 }
  0x84   :  { %p1735_p6 = scmp.ne.s32.totalorder %s2290_s7, %s1734_s6  ;;  %p1738_p7 = scmp.lt.u32.totalorder %s1734_s6, %s2290_s7 }
  0x86   :  { %p1740_p8 = pnand %p1738_p7, %p1735_p6 }
  0x88   :  { %1743 = shalt.err (!%p1740_p8)
}
  0x89   :  { %s1744_s4 = scalar_lea.vmem %s92_s26, 832  ;;  %p1749_p10 = scmp.lt.s32.totalorder %s92_s26, %s92_s26 }
  0x8a   :  { %p1745_p9 = scmp.ne.s32.totalorder %s92_s26, %s1744_s4  ;;  %p1750_p11 = scmp.lt.s32.totalorder %s1744_s4, %s1744_s4 }
  0x8c   :  { %p1751_p12 = por %p1750_p11, %p1749_p10 }
  0x8e   :  { %p1752_p13 = pnand %p1751_p12, %p1745_p9 }
  0x90   :  { %1755 = shalt.err (!%p1752_p13)
}
  0x91   :  { %97 = dma.hbm_to_vmem [thread:$0]  %s2290_s7, 832, %s92_s26, [#allocation9], %s1839_s3, %s1839_s3, %s1840_s1  }
  0x92   :  { %s1845_s30 = smov [#allocation13]   ;;  %s1846_s20 = smov [#allocation16]  }
  0x93   :  { %s119_s5 = sshll.u32 %s1845_s30, 4  ;;  %s149_s21 = sshll.u32 %s1846_s20, 4  ;;  %s120_s5 = int_to_ptr.vmem [resolvable:$true] %s119_s5  ;;  %s150_s21 = int_to_ptr.vmem [resolvable:$true] %s149_s21 }
  0x94   :  { %s1756_s9 = scalar_lea.hbm %s2294_s11, 1024 }
  0x95   :  { %p1757_p0 = scmp.ne.s32.totalorder %s2294_s11, %s1756_s9  ;;  %p1760_p1 = scmp.lt.u32.totalorder %s1756_s9, %s2294_s11 }
  0x97   :  { %p1762_p2 = pnand %p1760_p1, %p1757_p0 }
  0x99   :  { %1765 = shalt.err (!%p1762_p2)
}
  0x9a   :  { %s1766_s7 = scalar_lea.vmem %s120_s5, 1024  ;;  %p1771_p4 = scmp.lt.s32.totalorder %s120_s5, %s120_s5 }
  0x9b   :  { %p1767_p3 = scmp.ne.s32.totalorder %s120_s5, %s1766_s7  ;;  %p1772_p5 = scmp.lt.s32.totalorder %s1766_s7, %s1766_s7 }
  0x9d   :  { %p1773_p6 = por %p1772_p5, %p1771_p4 }
  0x9f   :  { %p1774_p7 = pnand %p1773_p6, %p1767_p3 }
  0xa1   :  { %1777 = shalt.err (!%p1774_p7)
}
  0xa2   :  { %125 = dma.hbm_to_vmem [thread:$0]  %s2294_s11, 1024, %s120_s5, [#allocation12], %s1839_s3, %s1839_s3, %s1840_s1  }
  0xa3   :  { %s1778_s27 = scalar_lea.hbm %s2300_s17, 1024 }
  0xa4   :  { %p1779_p8 = scmp.ne.s32.totalorder %s2300_s17, %s1778_s27  ;;  %p1782_p9 = scmp.lt.u32.totalorder %s1778_s27, %s2300_s17 }
  0xa6   :  { %p1784_p10 = pnand %p1782_p9, %p1779_p8 }
  0xa8   :  { %1787 = shalt.err (!%p1784_p10)
}
  0xa9   :  { %s1788_s9 = scalar_lea.vmem %s150_s21, 1024  ;;  %p1793_p12 = scmp.lt.s32.totalorder %s150_s21, %s150_s21 }
  0xaa   :  { %p1789_p11 = scmp.ne.s32.totalorder %s150_s21, %s1788_s9  ;;  %p1794_p13 = scmp.lt.s32.totalorder %s1788_s9, %s1788_s9 }
  0xac   :  { %p1795_p0 = por %p1794_p13, %p1793_p12 }
  0xae   :  { %p1796_p1 = pnand %p1795_p0, %p1789_p11 }
  0xb0   :  { %1799 = shalt.err (!%p1796_p1)
}
  0xb1   :  { %155 = dma.hbm_to_vmem [thread:$0]  %s2300_s17, 1024, %s150_s21, [#allocation15], %s1839_s3, %s1839_s3, %s1840_s1  }
  0xb2   :  { %1822 = dma.done.wait [#allocation3], 512  }
  0xb3   :  { %1823 = vsyncadd [#allocation3], 4294966784 }
  0xb4   :  { %1824 = dma.done.wait [#allocation6], 512  }
  0xb5   :  { %1825 = vsyncadd [#allocation6], 4294966784 }
  0xb6   :  { %1826 = dma.done.wait [#allocation9], 1088  }
  0xb7   :  { %1827 = vsyncadd [#allocation9], 4294966208 }
  0xb8   :  { %1828 = dma.done.wait [#allocation12], 2048  }
  0xb9   :  { %1829 = vsyncadd [#allocation12], 4294965248 }
  0xba   :  { %1830 = dma.done.wait [#allocation15], 1040  }
  0xbb   :  { %1831 = vsyncadd [#allocation15], 4294966256  ;;  %v1847_v0 = vmov 0.0   ;;  %vm1848_vm0 = vmmov 0   ;;  %v1541_v1 = vld [vmem:[#allocation8] sm:$0xff]   ;;  %s2323_s1 = sld [smem:[#allocation29_spill]] }
  0xbc   :  { %1387 = vmatprep.subr.bf16.mxu0 %v1847_v0  ;;  %1395 = vmatprep.subr.bf16.mxu1 %v1847_v0  ;;  %v1543_v3 = vld [vmem:[#allocation8 + $0x8] sm:$0xff]   ;;  %v209_v5 = vld [vmem:[#allocation7] sm:$0xff]  ;;  %v210_v6 = vld [vmem:[#allocation7 + $0x8] sm:$0xff]  ;;  %vm228_vm1 = vcmask 261120   ;;  %vm451_vm2 = vcmask 850944   ;;  %vm464_vm3 = vcmask 1043456  }
  0xbd   :  { %1391 = vmatprep.mubr.msk.bf16.mxu0 %vm1848_vm0, %v1847_v0  ;;  %1411 = vmatprep.mubr.msk.bf16.mxu1 %vm1848_vm0, %v1847_v0  ;;  %v211_v7 = vpack.c.bf16 %v210_v6, %v209_v5  ;;  %v1545_v8 = vld [vmem:[#allocation10] sm:$0xff]   ;;  %v1547_v10 = vld [vmem:[#allocation10 + $0x8] sm:$0xff]   ;;  %v1549_v12 = vld [vmem:[#allocation10 + $0x10] sm:$0xff]   ;;  %s2324_s11 = sld [smem:[#allocation27_spill]]  ;;  %vm759_vm4 = vcmask 7168   ;;  %v1849_v39 = vmov 0  }
  0xbe   :  { %1388 = vmatpush3.bf16.msra.mxu0 %v1541_v1  ;;  %v1551_v14 = vld [vmem:[#allocation10 + $0x18] sm:$0xff]   ;;  %v1557_v16 = vld [vmem:[#allocation10 + $0x30] ss:$0 sps:$4 sm:$0xff]   ;;  %v1553_v18 = vld [vmem:[#allocation10 + $0x20] sm:$0xff]   ;;  %1540 = vset.pattern.permute.xlu1 %v1849_v39  ;;  %s2326_s5 = sld [smem:[#allocation30_spill]]  ;;  %s1850_s17 = smov [#allocation17]  }
  0xbf   :  { %1389 = vmatprep.subr.bf16.mxu0 %v1847_v0  ;;  %v1558_v17 = vld [vmem:[#allocation2] sm:$0xff]   ;;  %v1555_v20 = vld [vmem:[#allocation10 + $0x28] sm:$0xff]   ;;  %v466_v21 = vsel %vm464_vm3, %v1557_v16, 0  ;;  %v2134_v24 = vld [vmem:[#allocation5 + $0x8] sm:$0xff]  ;;  %1539 = vset.pattern.permute.xlu0 %v1849_v39  ;;  %s1241_s3 = sshll.u32 %s1850_s17, 4  ;;  %s1242_s3 = int_to_ptr.vmem [resolvable:$true] %s1241_s3 }
  0xc0   :  { %v2132_v23 = vld [vmem:[#allocation5] sm:$0xff]  ;;  %v1559_v26 = vld [vmem:[#allocation2 + $0x8] sm:$0xff]   ;;  %v1560_v27 = vld [vmem:[#allocation2 + $0x10] sm:$0xff]   ;;  %p1805_p3 = scmp.lt.s32.totalorder %s1242_s3, %s1242_s3 }
  0xc1   :  { %v1542_v2 = vld [vmem:[%s2323_s1] sm:$0xff]   ;;  %v1544_v4 = vld [vmem:[%s2323_s1 + $0x8] sm:$0xff]   ;;  %v1546_v9 = vld [vmem:[%s2323_s1 + $0x10] sm:$0xff]   ;;  %v192_v25 = vpack.c.bf16 %v2134_v24, %v2132_v23 }
  0xc2   :  { %1396 = vmatpush3.bf16.msra.mxu1 %v1542_v2  ;;  %1390 = vmatpush3.bf16.msra.mxu0 %v1543_v3  ;;  %v1548_v11 = vld [vmem:[%s2323_s1 + $0x18] sm:$0xff]   ;;  %v1550_v13 = vld [vmem:[%s2323_s1 + $0x20] sm:$0xff]   ;;  %v1552_v15 = vld [vmem:[%s2323_s1 + $0x28] sm:$0xff]  }
  0xc3   :  { %1397 = vmatprep.subr.bf16.mxu1 %v1847_v0  ;;  %1415 = vmatprep.subr.bf16.mxu0 %v1545_v8  ;;  %v1554_v19 = vld [vmem:[%s2323_s1 + $0x30] sm:$0xff]   ;;  %v1556_v22 = vld [vmem:[%s2323_s1 + $0x38] sm:$0xff]   ;;  %v1562_v29 = vld [vmem:[#allocation11] sm:$0xff]  }
  0xc4   :  { %v1561_v28 = vld [vmem:[#allocation2 + $0x18] sm:$0xff]   ;;  %v1563_v30 = vld [vmem:[#allocation11 + $0x8] sm:$0xff]   ;;  %v1566_v33 = vld [vmem:[#allocation11 + $0x20] sm:$0xff]  }
  0xc5   :  { %1392 = vmatmul.mubr.msk.bf16.vlgmr.msra.gmra.mrb[0].mxu0 %vm228_vm1, %v211_v7  ;;  %v1564_v31 = vld [vmem:[#allocation11 + $0x10] sm:$0xff]   ;;  %v1565_v32 = vld [vmem:[#allocation11 + $0x18] sm:$0xff]   ;;  %v1567_v34 = vld [vmem:[#allocation11 + $0x28] sm:$0xff]  }
  0xc6   :  { %1398 = vmatpush3.bf16.msra.mxu1 %v1544_v4  ;;  %1416 = vmatpush3.bf16.msra.mxu0 %v1545_v8  ;;  %v1568_v35 = vld [vmem:[#allocation11 + $0x30] sm:$0xff]   ;;  %v1569_v36 = vld [vmem:[#allocation11 + $0x38] sm:$0xff]   ;;  %v698_v41 = vld [vmem:[%s2324_s11 + $0x8] sm:$0xff] }
  0xc7   :  { %1399 = vmatprep.subr.bf16.mxu1 %v1847_v0  ;;  %1417 = vmatprep.subr.bf16.mxu0 %v1547_v10  ;;  %v699_v37 = vld [vmem:[%s2324_s11 + $0x10] sm:$0xff]  ;;  %v697_v38 = vld [vmem:[%s2324_s11] sm:$0xff]  ;;  %v700_v40 = vld [vmem:[%s2324_s11 + $0x18] sm:$0xff]  ;;  %v767_v45 = vsel %vm759_vm4, %v698_v41, 0.0 }
  0xc8   :  { %1429 = vmatprep.mubr.msk.bf16.mxu0 %vm451_vm2, %v1558_v17  ;;  %717 = vperm.xlu1 %1540, %v699_v37   ;;  %v761_v42 = vsel %vm759_vm4, %v699_v37, 0.0  ;;  %v760_v43 = vsel %vm759_vm4, %v697_v38, 0.0  ;;  %v768_v44 = vsel %vm759_vm4, %v700_v40, 0.0  ;;  %v1570_v46 = vld [vmem:[#allocation13] sm:$0xff]   ;;  %v704_v53 = vld [vmem:[%s2324_s11 + $0x38] sm:$0xff]  ;;  %v703_v54 = vld [vmem:[%s2324_s11 + $0x30] sm:$0xff] }
  0xc9   :  { %707 = vperm.xlu0 %1539, %v697_v38   ;;  %v762_v47 = vadd.f32 %v761_v42, %v760_v43  ;;  %v769_v48 = vadd.f32 %v768_v44, %v767_v45  ;;  %v702_v49 = vld [vmem:[%s2324_s11 + $0x28] sm:$0xff]  ;;  %v701_v50 = vld [vmem:[%s2324_s11 + $0x20] sm:$0xff]  ;;  %v772_v58 = vsel %vm759_vm4, %v704_v53, 0.0  ;;  %v765_v59 = vsel %vm759_vm4, %v703_v54, 0.0  ;;  %v1572_v42 = vld [vmem:[#allocation13 + $0x10] sm:$0xff]  }
  0xca   :  { %1400 = vmatpush3.bf16.msra.mxu1 %v1546_v9  ;;  %1418 = vmatpush3.bf16.msra.mxu0 %v1547_v10  ;;  %v770_v51 = vsel %vm759_vm4, %v702_v49, 0.0  ;;  %v763_v52 = vsel %vm759_vm4, %v701_v50, 0.0  ;;  %v1571_v55 = vld [vmem:[#allocation13 + $0x8] sm:$0xff]   ;;  %v1268_v4 = vld [vmem:[%s2291_s8] ss:$0 sm:$0xff]  ;;  %v1574_v44 = vld [vmem:[#allocation13 + $0x20] sm:$0xff]  }
  0xcb   :  { %1401 = vmatprep.subr.bf16.mxu1 %v1847_v0  ;;  %1419 = vmatprep.subr.bf16.mxu0 %v1549_v12  ;;  %v771_v56 = vadd.f32 %v770_v51, %v769_v48  ;;  %v764_v57 = vadd.f32 %v763_v52, %v762_v47  ;;  %v1573_v43 = vld [vmem:[#allocation13 + $0x18] sm:$0xff]   ;;  %v1575_v45 = vld [vmem:[#allocation13 + $0x28] sm:$0xff]   ;;  %s2325_s8 = sld [smem:[#allocation28_spill]] }
  0xcc   :  { %722 = vperm.xlu1 %1540, %v700_v40   ;;  %v1577_v47 = vld [vmem:[#allocation13 + $0x38] sm:$0xff]  }
  0xcd   :  { %712 = vperm.xlu0 %1539, %v698_v41   ;;  %v773_v60 = vadd.f32 %v772_v58, %v771_v56  ;;  %v766_v61 = vadd.f32 %v765_v59, %v764_v57 }
  0xce   :  { %1402 = vmatpush3.bf16.msra.mxu1 %v1548_v11  ;;  %1420 = vmatpush3.bf16.msra.mxu0 %v1549_v12 }
  0xcf   :  { %1403 = vmatprep.subr.bf16.mxu1 %v1847_v0  ;;  %1421 = vmatprep.subr.bf16.mxu0 %v1551_v14 }
  0xd0   :  { %732 = vperm.xlu1 %1540, %v702_v49   ;;  %v1284_v49 = vld [vmem:[%s2293_s10] ss:$0 sm:$0xff] }
  0xd1   :  { %727 = vperm.xlu0 %1539, %v701_v50  }
  0xd2   :  { %1404 = vmatpush3.bf16.msra.mxu1 %v1550_v13  ;;  %1422 = vmatpush3.bf16.msra.mxu0 %v1551_v14 }
  0xd3   :  { %1405 = vmatprep.subr.bf16.mxu1 %v1847_v0  ;;  %1423 = vmatprep.subr.bf16.mxu0 %v1553_v18 }
  0xd4   :  { %742 = vperm.xlu1 %1540, %v704_v53  }
  0xd5   :  { %737 = vperm.xlu0 %1539, %v703_v54  }
  0xd6   :  { %1406 = vmatpush3.bf16.msra.mxu1 %v1552_v15  ;;  %1424 = vmatpush3.bf16.msra.mxu0 %v1553_v18 }
  0xd7   :  { %1407 = vmatprep.subr.bf16.mxu1 %v1847_v0  ;;  %1425 = vmatprep.subr.bf16.mxu0 %v1555_v20 }
  0xd8   :  { %805 = vperm.xlu1 %1540, %v773_v60  }
  0xd9   :  { %800 = vperm.xlu0 %1539, %v766_v61  }
  0xda   :  { %1408 = vmatpush3.bf16.msra.mxu1 %v1554_v19  ;;  %1426 = vmatpush3.bf16.msra.mxu0 %v1555_v20 }
  0xdb   :  { %1409 = vmatprep.subr.bf16.mxu1 %v1847_v0  ;;  %1521 = vmatprep.subr.msk.bf16.mxu0 %vm464_vm3, %v1557_v16 }
  0xde   :  { %1410 = vmatpush3.bf16.msra.mxu1 %v1556_v22  ;;  %1428 = vmatpush3.bf16.msra.mxu0 %v466_v21 }
  0xdf   :  { %1461 = vmatprep.subr.bf16.mxu0 %v1847_v0  ;;  %1437 = vmatprep.subr.bf16.mxu1 %v1562_v29 }
  0xe1   :  { %1412 = vmatmul.mubr.bf16.vlgmr.msra.gmra.mrb[0].mxu1 %v192_v25  ;;  %1430 = vmatmul.mubr.msk.bf16.vlgmr.msra.gmra.mrb[4].mxu0 %vm451_vm2, %v1559_v26 }
  0xe2   :  { %1433 = vmatprep.mubr.msk.bf16.mxu0 %vm451_vm2, %v1560_v27  ;;  %1438 = vmatpush3.bf16.msra.mxu1 %v1562_v29 }
  0xe3   :  { %1439 = vmatprep.subr.bf16.mxu1 %v1563_v30  ;;  %1462 = vmatpush3.bf16.msra.mxu0 %v1570_v46  ;;  %v1576_v46 = vld [vmem:[#allocation13 + $0x30] sm:$0xff]  }
  0xe4   :  { %1463 = vmatprep.subr.bf16.mxu0 %v1847_v0 }
  0xe6   :  { %1440 = vmatpush3.bf16.msra.mxu1 %v1563_v30 }
  0xe7   :  { %1441 = vmatprep.subr.bf16.mxu1 %v1564_v31  ;;  %1464 = vmatpush3.bf16.msra.mxu0 %v1571_v55 }
  0xe8   :  { %1465 = vmatprep.subr.bf16.mxu0 %v1847_v0 }
  0xe9   :  { %1434 = vmatmul.mubr.msk.bf16.gmra.mrb[8].mxu0 %vm451_vm2, %v1561_v28 }
  0xea   :  { %1477 = vmatprep.mubr.msk.bf16.mxu0 %vm1848_vm0, %v1847_v0  ;;  %1442 = vmatpush3.bf16.msra.mxu1 %v1564_v31 }
  0xeb   :  { %1443 = vmatprep.subr.bf16.mxu1 %v1565_v32  ;;  %1466 = vmatpush3.bf16.msra.mxu0 %v1572_v42 }
  0xec   :  { %1467 = vmatprep.subr.bf16.mxu0 %v1847_v0 }
  0xee   :  { %1444 = vmatpush3.bf16.msra.mxu1 %v1565_v32 }
  0xef   :  { %1445 = vmatprep.subr.bf16.mxu1 %v1566_v33  ;;  %1468 = vmatpush3.bf16.msra.mxu0 %v1573_v43 }
  0xf0   :  { %1469 = vmatprep.subr.bf16.mxu0 %v1847_v0 }
  0xf2   :  { %1446 = vmatpush3.bf16.msra.mxu1 %v1566_v33 }
  0xf3   :  { %1447 = vmatprep.subr.bf16.mxu1 %v1567_v34  ;;  %1470 = vmatpush3.bf16.msra.mxu0 %v1574_v44 }
  0xf4   :  { %1471 = vmatprep.subr.bf16.mxu0 %v1847_v0 }
  0xf6   :  { %1448 = vmatpush3.bf16.msra.mxu1 %v1567_v34 }
  0xf7   :  { %1449 = vmatprep.subr.bf16.mxu1 %v1568_v35  ;;  %1472 = vmatpush3.bf16.msra.mxu0 %v1575_v45 }
  0xf8   :  { %1473 = vmatprep.subr.bf16.mxu0 %v1847_v0 }
  0xfa   :  { %1450 = vmatpush3.bf16.msra.mxu1 %v1568_v35 }
  0xfb   :  { %1451 = vmatprep.subr.bf16.mxu1 %v1569_v36  ;;  %1474 = vmatpush3.bf16.msra.mxu0 %v1576_v46 }
  0xfc   :  { %1475 = vmatprep.subr.bf16.mxu0 %v1847_v0 }
  0xfe   :  { %1452 = vmatpush3.bf16.msra.mxu1 %v1569_v36 }
  0xff   :  { %1481 = vmatprep.subr.bf16.mxu1 %v1847_v0  ;;  %1476 = vmatpush3.bf16.msra.mxu0 %v1577_v47 }
 0x100   :  { %1501 = vmatprep.subr.bf16.mxu0 %v1847_v0 }
 0x147   :  { %v718_v50 = vpop.permute.xlu1 %717 }
 0x148   :  { %v708_v48 = vpop.permute.xlu0 %707 }
 0x14c   :  { %v713_v56 = vpop.permute.xlu0 %712 }
 0x198   :  { %v266_v62 = vpop.f32.mrb[0].mxu0 }
 0x199   :  { %v1393_v63 = vpop.f32.mrb[1].mxu0 }
 0x19a   :  { %v269_v1 = vpop.f32.mrb[2].mxu0 }
 0x19b   :  { %v1394_v2 = vpop.f32.mrb[3].mxu0 }
 0x1b4   :  { %v355_v3 = vpop.f32.mrb[0].mxu1  ;;  %v1431_v11 = vpop.f32.mrb[4].mxu0 }
 0x1b5   :  { %v356_v5 = vadd.f32 %v355_v3, %v266_v62  ;;  %v1413_v6 = vpop.f32.mrb[1].mxu1  ;;  %v502_v12 = vpop.f32.mrb[5].mxu0 }
 0x1b6   :  { %v358_v7 = vpop.f32.mrb[2].mxu1  ;;  %v1432_v16 = vpop.f32.mrb[6].mxu0 }
 0x1b7   :  { %v369_v8 = vadd.f32 %v1268_v4, %v356_v5  ;;  %v359_v9 = vadd.f32 %v358_v7, %v269_v1  ;;  %v1414_v10 = vpop.f32.mrb[3].mxu1  ;;  %v505_v17 = vpop.f32.mrb[7].mxu0 }
 0x1b8   :  { %v723_v62 = vpop.permute.xlu1 %722 }
 0x1b9   :  { %v370_v13 = vadd.f32 %v1268_v4, %v359_v9  ;;  %v535_v14 = vadd.f32 %v1431_v11, %v369_v8  ;;  %v533_v15 = vadd.f32 %v502_v12, %v369_v8 }
 0x1bb   :  { %v536_v18 = vadd.f32 %v1432_v16, %v370_v13  ;;  %v534_v19 = vadd.f32 %v505_v17, %v370_v13  ;;  %v543_v20 = vmax.f32 %v535_v14, 0.0  ;;  %v541_v21 = vmax.f32 %v533_v15, 0.0 }
 0x1bc   :  { %v1435_v28 = vpop.f32.mrb[8].mxu0  ;;  %v733_v14 = vpop.permute.xlu1 %732 }
 0x1bd   :  { %v544_v22 = vmax.f32 %v536_v18, 0.0  ;;  %v542_v25 = vmax.f32 %v534_v19, 0.0  ;;  %v539_v29 = vadd.f32 %v1435_v28, %v369_v8  ;;  %v518_v30 = vpop.f32.mrb[9].mxu0 }
 0x1be   :  { %v537_v31 = vadd.f32 %v518_v30, %v369_v8  ;;  %v1436_v32 = vpop.f32.mrb[10].mxu0  ;;  %v728_v8 = vpop.permute.xlu0 %727 }
 0x1bf   :  { %v550_v26 = vpack.c.bf16 %v544_v22, %v543_v20  ;;  %v549_v27 = vpack.c.bf16 %v542_v25, %v541_v21  ;;  %v540_v33 = vadd.f32 %v1436_v32, %v370_v13  ;;  %v521_v34 = vpop.f32.mrb[11].mxu0  ;;  %v547_v36 = vmax.f32 %v539_v29, 0.0 }
 0x1c0   :  { %v538_v35 = vadd.f32 %v521_v34, %v370_v13  ;;  %v545_v38 = vmax.f32 %v537_v31, 0.0  ;;  %v743_v29 = vpop.permute.xlu1 %742 }
 0x1c1   :  { %1453 = vmatprep.mubr.bf16.mxu1 %v549_v27  ;;  %v548_v37 = vmax.f32 %v540_v33, 0.0 }
 0x1c2   :  { %1454 = vmatmul.mubr.bf16.vlgmr.msra.gmra.mrb[4].mxu1 %v550_v26  ;;  %v546_v39 = vmax.f32 %v538_v35, 0.0  ;;  %v738_v25 = vpop.permute.xlu0 %737  ;;  %v1293_v35 = vld [vmem:[#allocation14] ss:$0 sm:$0xff] }
 0x1c3   :  { %v552_v40 = vpack.c.bf16 %v548_v37, %v547_v36 }
 0x1c4   :  { %v551_v41 = vpack.c.bf16 %v546_v39, %v545_v38  ;;  %v806_v37 = vpop.permute.xlu1 %805 }
 0x1c6   :  { %1457 = vmatprep.mubr.bf16.mxu1 %v551_v41  ;;  %v801_v36 = vpop.permute.xlu0 %800 }
 0x1c7   :  { %v808_v38 = vmul.f32 %v1293_v35, %v801_v36 }
 0x1ca   :  { %1458 = vmatmul.mubr.bf16.gmra.mrb[8].mxu1 %v552_v40  ;;  %v809_v40 = vmul.f32 %v1293_v35, %v806_v37 }
 0x1cb   :  { %1497 = vmatprep.mubr.msk.bf16.mxu1 %vm1848_vm0, %v1847_v0 }
 0x295   :  { %v1455_v51 = vpop.f32.mrb[4].mxu1 }
 0x296   :  { %v667_v52 = vadd.f32 %v1455_v51, %v1284_v49  ;;  %v658_v53 = vpop.f32.mrb[5].mxu1 }
 0x297   :  { %v659_v54 = vadd.f32 %v1284_v49, %v658_v53  ;;  %v1456_v55 = vpop.f32.mrb[6].mxu1 }
 0x298   :  { %v691_v57 = vmax.f32 %v667_v52, 0.0  ;;  %v670_v58 = vadd.f32 %v1456_v55, %v1284_v49  ;;  %v661_v59 = vpop.f32.mrb[7].mxu1 }
 0x299   :  { %v689_v60 = vmax.f32 %v659_v54, 0.0  ;;  %v662_v61 = vadd.f32 %v1284_v49, %v661_v59 }
 0x29a   :  { %v747_v63 = vmul.f32 %v718_v50, %v691_v57  ;;  %v692_v1 = vmax.f32 %v670_v58, 0.0 }
 0x29b   :  { %v745_v2 = vmul.f32 %v708_v48, %v689_v60  ;;  %v690_v3 = vmax.f32 %v662_v61, 0.0  ;;  %v1578_v48 = vld [vmem:[%s2298_s15] sm:$0xff]   ;;  %v1579_v60 = vld [vmem:[%s2298_s15 + $0x8] sm:$0xff]   ;;  %v1580_v61 = vld [vmem:[%s2298_s15 + $0x10] sm:$0xff]  }
 0x29c   :  { %v748_v4 = vmul.f32 %v723_v62, %v692_v1  ;;  %1482 = vmatpush3.bf16.msra.mxu1 %v1578_v48  ;;  %v1581_v62 = vld [vmem:[%s2298_s15 + $0x18] sm:$0xff]   ;;  %v1583_v1 = vld [vmem:[%s2298_s15 + $0x28] sm:$0xff]  }
 0x29d   :  { %v753_v5 = vadd.f32 %v747_v63, %v745_v2  ;;  %v746_v6 = vmul.f32 %v713_v56, %v690_v3  ;;  %v1459_v7 = vpop.f32.mrb[8].mxu1  ;;  %1483 = vmatprep.subr.bf16.mxu1 %v1847_v0  ;;  %v1582_v63 = vld [vmem:[%s2298_s15 + $0x20] sm:$0xff]   ;;  %v1584_v2 = vld [vmem:[%s2298_s15 + $0x30] sm:$0xff]   ;;  %v1585_v3 = vld [vmem:[%s2298_s15 + $0x38] sm:$0xff]  }
 0x29e   :  { %v683_v9 = vadd.f32 %v1459_v7, %v1284_v49  ;;  %v674_v10 = vpop.f32.mrb[9].mxu1  ;;  %v1589_v7 = vld [vmem:[#allocation16 + $0x18] sm:$0xff]  }
 0x29f   :  { %v756_v11 = vadd.f32 %v748_v4, %v746_v6  ;;  %v675_v12 = vadd.f32 %v1284_v49, %v674_v10  ;;  %v1460_v13 = vpop.f32.mrb[10].mxu1  ;;  %v1586_v4 = vld [vmem:[#allocation16] sm:$0xff]   ;;  %v1588_v6 = vld [vmem:[#allocation16 + $0x10] sm:$0xff]  }
 0x2a0   :  { %v686_v15 = vadd.f32 %v1460_v13, %v1284_v49  ;;  %v677_v16 = vpop.f32.mrb[11].mxu1  ;;  %v695_v17 = vmax.f32 %v683_v9, 0.0  ;;  %1484 = vmatpush3.bf16.msra.mxu1 %v1579_v60  ;;  %v1591_v9 = vld [vmem:[#allocation16 + $0x28] sm:$0xff]  }
 0x2a1   :  { %v693_v18 = vmax.f32 %v675_v12, 0.0  ;;  %v678_v19 = vadd.f32 %v1284_v49, %v677_v16  ;;  %v899_v49 = vlaneseq  ;;  %1485 = vmatprep.subr.bf16.mxu1 %v1847_v0 }
 0x2a2   :  { %v696_v21 = vmax.f32 %v686_v15, 0.0  ;;  %v751_v26 = vmul.f32 %v738_v25, %v695_v17 }
 0x2a3   :  { %v749_v20 = vmul.f32 %v728_v8, %v693_v18  ;;  %v694_v22 = vmax.f32 %v678_v19, 0.0  ;;  %v900_v50 = vand.u32 127, %v899_v49  ;;  %v1590_v8 = vld [vmem:[#allocation16 + $0x20] sm:$0xff]   ;;  %v1303_v18 = vld [vmem:[%s2296_s13] ss:$0 sm:$0xff] }
 0x2a4   :  { %v752_v31 = vmul.f32 %v743_v29, %v696_v21  ;;  %1486 = vmatpush3.bf16.msra.mxu1 %v1580_v61  ;;  %v1592_v29 = vld [vmem:[#allocation16 + $0x30] sm:$0xff]  }
 0x2a5   :  { %v754_v27 = vadd.f32 %v753_v5, %v749_v20  ;;  %v750_v28 = vmul.f32 %v733_v14, %v694_v22  ;;  %vm901_vm5 = vcmp.lt.s32.totalorder %v900_v50, 32  ;;  %1487 = vmatprep.subr.bf16.mxu1 %v1847_v0  ;;  %v1587_v5 = vld [vmem:[#allocation16 + $0x8] sm:$0xff]   ;;  %v1304_v22 = vld [vmem:[%s2297_s14] ss:$0 sm:$0xff] }
 0x2a6   :  { %v2204_v54 = vsel %vm901_vm5, 1.0, %v1847_v0 }
 0x2a7   :  { %v755_v30 = vadd.f32 %v754_v27, %v751_v26  ;;  %v757_v32 = vadd.f32 %v756_v11, %v750_v28 }
 0x2a8   :  { %1488 = vmatpush3.bf16.msra.mxu1 %v1581_v62 }
 0x2a9   :  { %v758_v33 = vadd.f32 %v757_v32, %v752_v31  ;;  %1489 = vmatprep.subr.bf16.mxu1 %v1847_v0  ;;  %v1305_v31 = vld [vmem:[%s2299_s16] ss:$0 sm:$0xff] }
 0x2ab   :  { %v774_v34 = vpack.c.bf16 %v758_v33, %v755_v30  ;;  %v1593_v30 = vld [vmem:[#allocation16 + $0x38] sm:$0xff]  }
 0x2ac   :  { %1490 = vmatpush3.bf16.msra.mxu1 %v1582_v63 }
 0x2ad   :  { %1478 = vmatmul.mubr.bf16.vlgmr.msra.gmra.mrb[12].mxu0 %v774_v34  ;;  %1491 = vmatprep.subr.bf16.mxu1 %v1847_v0 }
 0x2ae   :  { %1517 = vmatprep.mubr.msk.bf16.mxu0 %vm1848_vm0, %v1847_v0  ;;  %1502 = vmatpush3.bf16.msra.mxu0 %v1586_v4 }
 0x2af   :  { %1503 = vmatprep.subr.bf16.mxu0 %v1847_v0 }
 0x2b0   :  { %1492 = vmatpush3.bf16.msra.mxu1 %v1583_v1 }
 0x2b1   :  { %1493 = vmatprep.subr.bf16.mxu1 %v1847_v0 }
 0x2b2   :  { %1504 = vmatpush3.bf16.msra.mxu0 %v1587_v5 }
 0x2b3   :  { %1505 = vmatprep.subr.bf16.mxu0 %v1847_v0 }
 0x2b4   :  { %1494 = vmatpush3.bf16.msra.mxu1 %v1584_v2 }
 0x2b5   :  { %1495 = vmatprep.subr.bf16.mxu1 %v1847_v0 }
 0x2b6   :  { %1506 = vmatpush3.bf16.msra.mxu0 %v1588_v6  ;;  %v1324_v6 = vld [vmem:[%s2326_s5] ss:$0 sm:$0xff] }
 0x2b7   :  { %1507 = vmatprep.subr.bf16.mxu0 %v1847_v0 }
 0x2b8   :  { %1496 = vmatpush3.bf16.msra.mxu1 %v1585_v3  ;;  %v1323_v3 = vld [vmem:[%s2302_s19] ss:$0 sm:$0xff]  ;;  %s1800_s19 = scalar_lea.vmem %s1242_s3, 256 }
 0x2b9   :  { %p1801_p2 = scmp.ne.s32.totalorder %s1242_s3, %s1800_s19  ;;  %p1806_p4 = scmp.lt.s32.totalorder %s1800_s19, %s1800_s19 }
 0x2ba   :  { %1508 = vmatpush3.bf16.msra.mxu0 %v1589_v7 }
 0x2bb   :  { %1509 = vmatprep.subr.bf16.mxu0 %v1847_v0  ;;  %p1807_p5 = por %p1806_p4, %p1805_p3 }
 0x2bd   :  { %p1808_p6 = pnand %p1807_p5, %p1801_p2 }
 0x2be   :  { %1510 = vmatpush3.bf16.msra.mxu0 %v1590_v8 }
 0x2bf   :  { %1511 = vmatprep.subr.bf16.mxu0 %v1847_v0 }
 0x2c2   :  { %1512 = vmatpush3.bf16.msra.mxu0 %v1591_v9 }
 0x2c3   :  { %1513 = vmatprep.subr.bf16.mxu0 %v1847_v0 }
 0x2c6   :  { %1514 = vmatpush3.bf16.msra.mxu0 %v1592_v29 }
 0x2c7   :  { %1515 = vmatprep.subr.bf16.mxu0 %v1847_v0  ;;  %v1314_v0 = vld [vmem:[%s2301_s18] ss:$0 sm:$0xff] }
 0x2ca   :  { %1516 = vmatpush3.bf16.msra.mxu0 %v1593_v30 }
 0x380   :  { %v892_v39 = vpop.f32.mrb[12].mxu0 }
 0x381   :  { %v893_v41 = vadd.f32 %v892_v39, %v808_v38  ;;  %v1479_v42 = vpop.f32.mrb[13].mxu0 }
 0x382   :  { %v895_v43 = vpop.f32.mrb[14].mxu0 }
 0x383   :  { %v896_v44 = vadd.f32 %v895_v43, %v809_v40  ;;  %v1480_v45 = vpop.f32.mrb[15].mxu0  ;;  %v904_v46 = vadd.f32 %v893_v41, %v2132_v23 }
 0x385   :  { %908 = vadd.xlane.f32.xlu0 %v904_v46  ;;  %v905_v47 = vadd.f32 %v896_v44, %v2134_v24 }
 0x387   :  { %910 = vadd.xlane.f32.xlu1 %v905_v47 }
 0x412   :  { %v909_v51 = vpop.xlane.xlu0 %908 }
 0x413   :  { %v912_v52 = vmul.f32 0.03125, %v909_v51 }
 0x414   :  { %v911_v53 = vpop.xlane.xlu1 %910 }
 0x415   :  { %v914_v23 = vsub.f32 %v904_v46, %v912_v52  ;;  %v913_v55 = vmul.f32 0.03125, %v911_v53 }
 0x417   :  { %v915_v24 = vsub.f32 %v905_v47, %v913_v55  ;;  %v916_v56 = vmul.f32 %v2204_v54, %v914_v23 }
 0x419   :  { %v918_v57 = vmul.f32 %v916_v56, %v916_v56  ;;  %v917_v58 = vmul.f32 %v2204_v54, %v915_v24 }
 0x41b   :  { %920 = vadd.xlane.f32.xlu0 %v918_v57  ;;  %v919_v59 = vmul.f32 %v917_v58, %v917_v58 }
 0x41f   :  { %922 = vadd.xlane.f32.xlu0 %v919_v59  ;;  %v1221_v59 = vld [vmem:[%s2325_s8 + $0x8] sm:$0xff] }
 0x4a8   :  { %v921_v10 = vpop.xlane.xlu0 %920 }
 0x4a9   :  { %v924_v11 = vmul.f32 0.03125, %v921_v10 }
 0x4ab   :  { %v926_v12 = vadd.f32 1e-05, %v924_v11 }
 0x4ac   :  { %v923_v13 = vpop.xlane.xlu0 %922 }
 0x4ad   :  { %1594 = vrsqrt.f32 %v926_v12  ;;  %v925_v14 = vmul.f32 0.03125, %v923_v13 }
 0x4af   :  { %v927_v15 = vadd.f32 1e-05, %v925_v14 }
 0x4b1   :  { %1596 = vrsqrt.f32 %v927_v15 }
 0x4b7   :  { %v1595_v16 = vpop.eup %1594 }
 0x4b8   :  { %v930_v17 = vmul.f32 %v1595_v16, %v916_v56 }
 0x4ba   :  { %v938_v20 = vmul.f32 %v1303_v18, %v930_v17 }
 0x4bb   :  { %v1597_v19 = vpop.eup %1596 }
 0x4bc   :  { %v931_v21 = vmul.f32 %v1597_v19, %v917_v58  ;;  %v946_v26 = vadd.f32 %v1304_v22, %v938_v20  ;;  %v1220_v58 = vld [vmem:[%s2325_s8] sm:$0xff] }
 0x4be   :  { %v939_v25 = vmul.f32 %v1303_v18, %v931_v21 }
 0x4c0   :  { %v947_v27 = vadd.f32 %v1304_v22, %v939_v25 }
 0x4c2   :  { %v948_v28 = vpack.c.bf16 %v947_v27, %v946_v26 }
 0x4c4   :  { %1498 = vmatmul.mubr.bf16.vlgmr.msra.gmra.mrb[12].mxu1 %v948_v28 }
 0x597   :  { %v1054_v32 = vpop.f32.mrb[12].mxu1 }
 0x598   :  { %v1055_v33 = vadd.f32 %v1305_v31, %v1054_v32  ;;  %v1499_v34 = vpop.f32.mrb[13].mxu1 }
 0x599   :  { %v1057_v35 = vpop.f32.mrb[14].mxu1 }
 0x59a   :  { %v1058_v36 = vadd.f32 %v1305_v31, %v1057_v35  ;;  %v1500_v37 = vpop.f32.mrb[15].mxu1  ;;  %v1061_v38 = vmax.f32 %v1055_v33, 0.0 }
 0x59c   :  { %v1062_v39 = vmax.f32 %v1058_v36, 0.0 }
 0x59e   :  { %v1063_v40 = vpack.c.bf16 %v1062_v39, %v1061_v38 }
 0x5a0   :  { %1518 = vmatmul.mubr.bf16.vlgmr.msra.gmra.mrb[16].mxu0 %v1063_v40 }
 0x673   :  { %v1169_v41 = vpop.f32.mrb[16].mxu0 }
 0x674   :  { %v1170_v42 = vadd.f32 %v1314_v0, %v1169_v41  ;;  %v1519_v43 = vpop.f32.mrb[17].mxu0 }
 0x675   :  { %v1172_v44 = vpop.f32.mrb[18].mxu0 }
 0x676   :  { %v1173_v45 = vadd.f32 %v1314_v0, %v1172_v44  ;;  %v1520_v46 = vpop.f32.mrb[19].mxu0  ;;  %v1176_v47 = vadd.f32 %v1170_v42, %v946_v26 }
 0x678   :  { %1180 = vadd.xlane.f32.xlu1 %v1176_v47  ;;  %v1177_v48 = vadd.f32 %v1173_v45, %v947_v27 }
 0x67a   :  { %1182 = vadd.xlane.f32.xlu0 %v1177_v48 }
 0x705   :  { %v1181_v49 = vpop.xlane.xlu1 %1180 }
 0x706   :  { %v1184_v50 = vmul.f32 0.03125, %v1181_v49 }
 0x707   :  { %v1183_v51 = vpop.xlane.xlu0 %1182 }
 0x708   :  { %v1186_v52 = vsub.f32 %v1176_v47, %v1184_v50  ;;  %v1185_v53 = vmul.f32 0.03125, %v1183_v51 }
 0x70a   :  { %v1187_v23 = vsub.f32 %v1177_v48, %v1185_v53  ;;  %v1188_v55 = vmul.f32 %v2204_v54, %v1186_v52 }
 0x70c   :  { %v1190_v24 = vmul.f32 %v1188_v55, %v1188_v55  ;;  %v1189_v56 = vmul.f32 %v2204_v54, %v1187_v23 }
 0x70e   :  { %1192 = vadd.xlane.f32.xlu1 %v1190_v24  ;;  %v1191_v57 = vmul.f32 %v1189_v56, %v1189_v56 }
 0x710   :  { %1194 = vadd.xlane.f32.xlu0 %v1191_v57 }
 0x71f   :  { %1224 = vperm.xlu1 %1540, %v1220_v58  }
 0x726   :  { %1229 = vperm.xlu0 %1539, %v1221_v59  }
 0x79b   :  { %v1193_v60 = vpop.xlane.xlu1 %1192 }
 0x79c   :  { %v1196_v61 = vmul.f32 0.03125, %v1193_v60 }
 0x79d   :  { %v1195_v62 = vpop.xlane.xlu0 %1194 }
 0x79e   :  { %v1198_v63 = vadd.f32 1e-05, %v1196_v61  ;;  %v1197_v1 = vmul.f32 0.03125, %v1195_v62 }
 0x79f   :  { %v1225_v11 = vpop.permute.xlu1 %1224 }
 0x7a0   :  { %1598 = vrsqrt.f32 %v1198_v63  ;;  %v1199_v54 = vadd.f32 1e-05, %v1197_v1 }
 0x7a2   :  { %1600 = vrsqrt.f32 %v1199_v54 }
 0x7a5   :  { %v1230_v14 = vpop.permute.xlu0 %1229 }
 0x7aa   :  { %v1599_v2 = vpop.eup %1598 }
 0x7ab   :  { %v1202_v4 = vmul.f32 %v1599_v2, %v1188_v55 }
 0x7ac   :  { %v1601_v5 = vpop.eup %1600 }
 0x7ad   :  { %v1210_v7 = vmul.f32 %v1323_v3, %v1202_v4  ;;  %v1203_v8 = vmul.f32 %v1601_v5, %v1189_v56 }
 0x7af   :  { %v1218_v9 = vadd.f32 %v1324_v6, %v1210_v7  ;;  %v1211_v10 = vmul.f32 %v1323_v3, %v1203_v8 }
 0x7b1   :  { %v1232_v12 = vmul.f32 %v1225_v11, %v1218_v9  ;;  %v1219_v13 = vadd.f32 %v1324_v6, %v1211_v10 }
 0x7b3   :  { %1234 = vst [vmem:[#allocation17] sm:$0xff] %v1232_v12  ;;  %v1233_v15 = vmul.f32 %v1230_v14, %v1219_v13 }
 0x7b5   :  { %1235 = vst [vmem:[#allocation17 + $0x8] sm:$0xff] %v1233_v15 }
 0x7b6   :  { %1811 = shalt.err (!%p1808_p6)
}
 0x7b7   :  { %s2327_s6 = sld [smem:[#allocation31_spill]] }
 0x7bd   :  { %s1812_s25 = scalar_lea.hbm %s2327_s6, 256 }
 0x7be   :  { %p1813_p7 = scmp.ne.s32.totalorder %s2327_s6, %s1812_s25  ;;  %p1816_p8 = scmp.lt.u32.totalorder %s1812_s25, %s2327_s6 }
 0x7c0   :  { %p1818_p9 = pnand %p1816_p8, %p1813_p7 }
 0x7c2   :  { %1821 = shalt.err (!%p1818_p9)
}
 0x7c3   :  { %1247 = dma.vmem_to_hbm [thread:$0]  %s1242_s3, 256, %s2327_s6, [#allocation4], %s1835_s22, %s1835_s22, %s1836_s23  }
 0x7c4   :  { %1832 = dma.done.wait [#allocation4], 256  }
 0x7c5   :  { %1833 = vsyncadd [#allocation4], 4294967040 }
 0x7c6   :  { %1251 = vsyncpa [#allocation3], 1 }
 0x7c7   :  { %1252 = vsyncpa [#allocation6], 1 }
 0x7c8   :  { %1253 = vsyncpa [#allocation9], 1 }
 0x7c9   :  { %1254 = vsyncpa [#allocation12], 1 }
 0x7ca   :  { %1255 = vsyncpa [#allocation15], 1 }
 0x7cb   :  { %1256 = vsyncpa [#allocation4], 1 }

</bundles_post_ra>
